<compile_context>
chip_gen: v6e
topology: v6e:2x2x1
jax: 0.10.0
libtpu: 0.0.40
codegen_flags: <defaults>
</compile_context>

<pallas_src>
import numpy as np
import jax
import jax.numpy as jnp
from jax.experimental import pallas as pl
from jax.experimental.pallas import tpu as pltpu


_LANE = 128
_SUBLANE = 8


def _round_up(n, m):
    return ((n + m - 1) // m) * m


def _pad2d(a, rows, cols, dtype=None):
    a = jnp.asarray(a)
    if dtype is not None:
        a = a.astype(dtype)
    return jnp.pad(a, ((0, rows - a.shape[0]), (0, cols - a.shape[1])))


# ----------------------------------------------------------------------------
# Pallas kernel: stacked ResNet blocks + final linear (+ optional sigmoid)
# ----------------------------------------------------------------------------
def _make_deepcrossing_kernel(n_res_layers: int, sigmoid_out: bool):
    def kernel(x_ref, *refs):
        # refs = (w1, b1, w2, b2) * n_res_layers, w_lin_col, b_lin, out_ref
        out_ref = refs[-1]                           # (1, bt) lane-dense logit row
        params = refs[:-1]

        x_in = x_ref[...]                            # [bt, Dp], streamed dtype (f32 or bf16)
        x = x_in.astype(jnp.float32)                 # residual stream stays f32

        idx = 0
        for layer in range(n_res_layers):
            w1 = params[idx][...]                    # [Dp, Hp]  (f32 or bf16)
            b1 = params[idx + 1][...]                # [1, Hp]   f32
            w2 = params[idx + 2][...]                # [Hp, Dp]  (f32 or bf16)
            b2 = params[idx + 3][...]                # [1, Dp]   f32
            idx += 4

            # MXU matmuls: operands in the stored weight dtype, f32 accumulation.
            lhs = x_in if (layer == 0 and x_in.dtype == w1.dtype) else x.astype(w1.dtype)
            h = jnp.dot(lhs, w1, preferred_element_type=jnp.float32) + b1
            h = jnp.maximum(h, 0.0)                  # ReLU
            # TODO(synk): nn.Dropout inside ResNet treated as identity (eval mode).
            y = jnp.dot(h.astype(w2.dtype), w2, preferred_element_type=jnp.float32) + b2
            x = jnp.maximum(y + x, 0.0)              # residual add + ReLU (f32)

        w_lin = params[idx][...]                     # [Dp, 1]  f32 (column layout)
        b_lin = params[idx + 1][...]                 # [1, 1]   f32

        # Final N=1 linear off the MXU: one aligned XLU transpose of the residual stream,
        # VPU multiply, sublane reduction -> logits land lane-major as a [1, bt] row.
        x_t = jnp.transpose(x)                       # [Dp, bt]
        logit = jnp.sum(x_t * w_lin, axis=0, keepdims=True) + b_lin   # [1, bt]
        # TODO(synk): final nn.Dropout() treated as identity (eval mode).
        if sigmoid_out:
            logit = jax.nn.sigmoid(logit)
        out_ref[...] = logit                         # packed, lane-dense store

    return kernel


def deepcrossing_pallas(x_stack, res_params, lin_w, lin_b, *,
                        sigmoid_out=False, b_tile=1024, mxu_dtype=jnp.bfloat16):
    """x_stack: [B, stack_dim] f32; res_params: list of (w1[D,H], b1[1,H], w2[H,D], b2[1,D])."""
    B, D = x_stack.shape
    D_pad = _round_up(D, _LANE)

    use_bf16 = np.dtype(mxu_dtype) == np.dtype(jnp.bfloat16)
    stream_dtype = jnp.bfloat16 if use_bf16 else jnp.float32
    stream_itemsize = 2 if use_bf16 else 4

    # Batch tile: multiple of 8 sublanes (128-lane aligned once the batch is big enough so the
    # packed output row stays lane-dense), clamped so tiny batches still work.
    bt = min(_round_up(b_tile, _SUBLANE), _round_up(B, _SUBLANE))
    if bt >= _LANE:
        bt = _round_up(bt, _LANE)
    n_tiles = pl.cdiv(B, bt)
    # v7x megacore: an even number of grid steps keeps both TensorCores busy; only pad when the
    # extra tile is a small fraction of the work (1-TC v5e/v6e would otherwise just waste it).
    if n_tiles % 2 == 1 and n_tiles >= 6:
        n_tiles += 1
    B_pad = n_tiles * bt

    # bf16 streaming halves the input DMA bytes on the (default) bf16 MXU path.
    x_pad = _pad2d(x_stack.astype(stream_dtype), B_pad, D_pad)

    flat_params = []
    h_pads = []
    for (w1, b1, w2, b2) in res_params:
        H_pad = _round_up(w1.shape[1], _LANE)
        h_pads.append(H_pad)
        # Zero padding keeps the padded lanes of the residual stream exactly zero.
        flat_params += [
            _pad2d(w1, D_pad, H_pad, mxu_dtype),
            _pad2d(b1, 1, H_pad, jnp.float32),
            _pad2d(w2, H_pad, D_pad, mxu_dtype),
            _pad2d(b2, 1, D_pad, jnp.float32),
        ]
    # Final linear stored as a [D_pad, 1] column (matches the transposed residual stream).
    flat_params += [
        _pad2d(jnp.asarray(lin_w, jnp.float32).reshape(-1, 1), D_pad, 1, jnp.float32),
        jnp.asarray(lin_b, jnp.float32).reshape(1, 1),
    ]

    kernel = _make_deepcrossing_kernel(len(res_params), sigmoid_out)

    # VMEM budget from actual sizes (weights conservatively counted double-buffered) + headroom.
    weight_bytes = sum(int(p.size) * p.dtype.itemsize for p in flat_params)
    max_dim = max([D_pad] + h_pads)
    vmem_limit = (2 * weight_bytes                     # resident params (worst case 2 buffers)
                  + 2 * bt * D_pad * stream_itemsize   # double-buffered input tile
                  + 2 * bt * 4                         # double-buffered packed output row
                  + 6 * bt * max_dim * 4               # in-kernel f32 temporaries (x, h, y, ...)
                  + (4 << 20))                         # compiler scratch headroom
    vmem_limit = max(16 << 20, min(int(vmem_limit), 96 << 20))

    flops = sum(4 * B_pad * D_pad * hp for hp in h_pads) + 2 * B_pad * D_pad
    cost = pl.CostEstimate(
        flops=int(flops),
        transcendentals=int(B_pad if sigmoid_out else 0),
        bytes_accessed=int(int(x_pad.size) * stream_itemsize + weight_bytes + B_pad * 4),
    )

    def run(single_buffer_weights):
        # Activations: tiled over batch (double-buffered auto-pipeline). Weights/biases: full
        # arrays resident in VMEM with constant block index -> no re-DMA across grid steps;
        # request single buffering for them since their block never changes.
        weight_kwargs = dict(pipeline_mode=pl.Buffered(1)) if single_buffer_weights else {}
        in_specs = [pl.BlockSpec((bt, D_pad), lambda i: (i, 0))]
        in_specs += [pl.BlockSpec(p.shape, lambda i: (0, 0), **weight_kwargs)
                     for p in flat_params]
        # Packed, lane-dense output: one (1, bt) logit row per batch tile.
        out_specs = pl.BlockSpec((None, 1, bt), lambda i: (i, 0, 0))

        grid_spec = pltpu.PrefetchScalarGridSpec(
            num_scalar_prefetch=0,
            grid=(n_tiles,),
            in_specs=in_specs,
            out_specs=out_specs,
        )
        return pl.pallas_call(
            kernel,
            out_shape=jax.ShapeDtypeStruct((n_tiles, 1, bt), jnp.float32),
            grid_spec=grid_spec,
            compiler_params=pltpu.CompilerParams(
                # Batch axis is independent -> shard across both v7x TensorCores
                # (no-op on single-TC v5e/v6e).
                dimension_semantics=("parallel",),
                vmem_limit_bytes=vmem_limit,
            ),
            cost_estimate=cost,
        )(x_pad, *flat_params)

    try:
        out = run(True)
    except Exception:
        # TODO(synk): some jax versions reject a 1-deep pipeline_mode on constant operands;
        # fall back to default double buffering (costs only VMEM, never correctness).
        out = run(False)

    return out.reshape(B_pad)[:B]                     # squeeze(1) + drop batch padding


# ----------------------------------------------------------------------------
# Glue: embedding lookup + dense concat (plain JAX), deterministic init
# ----------------------------------------------------------------------------
def embed_and_stack(sparse_idx, dense_x, embed_tables):
    """sparse_idx: [B, n_sparse] int32, dense_x: [B, n_dense] float32."""
    embeds = [embed_tables[i][sparse_idx[:, i]] for i in range(len(embed_tables))]
    sparse_embed_x = jnp.concatenate(embeds, axis=-1)           # [B, n_sparse*E]
    return jnp.concatenate([sparse_embed_x, dense_x], axis=-1)  # [B, stack_dim]


def init_params(key, sparse_feat_and_nums, n_dense, embed_dim, res_layers):
    stack_dim = len(sparse_feat_and_nums) * embed_dim + n_dense
    keys = jax.random.split(key, 64)
    ki = iter(range(64))

    embed_tables = [
        jax.random.normal(keys[next(ki)], (num, embed_dim), jnp.float32) * 0.1
        for (_, num) in sparse_feat_and_nums
    ]

    res_params = []
    for hidden in res_layers:
        w1 = jax.random.normal(keys[next(ki)], (stack_dim, hidden), jnp.float32) * 0.1
        b1 = jax.random.normal(keys[next(ki)], (1, hidden), jnp.float32) * 0.01
        w2 = jax.random.normal(keys[next(ki)], (hidden, stack_dim), jnp.float32) * 0.1
        b2 = jax.random.normal(keys[next(ki)], (1, stack_dim), jnp.float32) * 0.01
        res_params.append((w1, b1, w2, b2))

    lin_w = jax.random.normal(keys[next(ki)], (stack_dim, 1), jnp.float32) * 0.1
    lin_b = jax.random.normal(keys[next(ki)], (1, 1), jnp.float32) * 0.01
    return embed_tables, res_params, lin_w, lin_b, stack_dim


def reference_forward(x_stack, res_params, lin_w, lin_b, sigmoid_out=False):
    hp = jax.lax.Precision.HIGHEST
    x = x_stack
    for (w1, b1, w2, b2) in res_params:
        h = jnp.maximum(jnp.dot(x, w1, precision=hp) + b1, 0.0)
        x = jnp.maximum(jnp.dot(h, w2, precision=hp) + b2 + x, 0.0)
    out = (jnp.dot(x, lin_w, precision=hp) + lin_b)[:, 0]
    if sigmoid_out:
        out = jax.nn.sigmoid(out)
    return out


# ----------------------------------------------------------------------------
if __name__ == "__main__":
    key = jax.random.PRNGKey(0)

    # Small synthetic config consistent with the module's __init__.
    sparse_feat_and_nums = [("user_id", 50), ("item_id", 40), ("cate_id", 10)]
    dense_feat = ["d0", "d1", "d2", "d3"]
    embed_dim = 8
    res_layers = [32, 16]
    sigmoid_out = True

    k_param, k_sparse, k_dense = jax.random.split(key, 3)
    embed_tables, res_params, lin_w, lin_b, stack_dim = init_params(
        k_param, sparse_feat_and_nums, len(dense_feat), embed_dim, res_layers
    )

    # ---- small shape (B=8, single grid step, default bf16 MXU/streaming path) ----
    batch = 8
    sparse_idx = jax.random.randint(
        k_sparse, (batch, len(sparse_feat_and_nums)), 0, 10, dtype=jnp.int32
    )
    dense_x = jax.random.normal(k_dense, (batch, len(dense_feat)), jnp.float32)
    x_stack = embed_and_stack(sparse_idx, dense_x, embed_tables)     # [B, stack_dim]

    out = deepcrossing_pallas(x_stack, res_params, lin_w, lin_b, sigmoid_out=sigmoid_out)
    out = jax.block_until_ready(out)
    ref = reference_forward(x_stack, res_params, lin_w, lin_b, sigmoid_out)
    assert out.shape == (batch,)
    assert jnp.allclose(out, ref, atol=3e-2), float(jnp.max(jnp.abs(out - ref)))

    # ---- exercise the batch grid (B=300 -> 3 tiles of 128), bf16 streaming ------
    batch2 = 300
    k_s2, k_d2 = jax.random.split(jax.random.PRNGKey(1))
    sparse_idx2 = jax.random.randint(
        k_s2, (batch2, len(sparse_feat_and_nums)), 0, 10, dtype=jnp.int32
    )
    dense_x2 = jax.random.normal(k_d2, (batch2, len(dense_feat)), jnp.float32)
    x_stack2 = embed_and_stack(sparse_idx2, dense_x2, embed_tables)

    out2 = deepcrossing_pallas(
        x_stack2, res_params, lin_w, lin_b, sigmoid_out=sigmoid_out, b_tile=128
    )
    out2 = jax.block_until_ready(out2)
    ref2 = reference_forward(x_stack2, res_params, lin_w, lin_b, sigmoid_out)
    assert out2.shape == (batch2,)
    assert jnp.allclose(out2, ref2, atol=3e-2), float(jnp.max(jnp.abs(out2 - ref2)))

    # ---- f32 MXU/streaming validation path (tight tolerance) --------------------
    out_f32 = deepcrossing_pallas(
        x_stack2, res_params, lin_w, lin_b,
        sigmoid_out=sigmoid_out, b_tile=128, mxu_dtype=jnp.float32
    )
    out_f32 = jax.block_until_ready(out_f32)
    assert out_f32.shape == (batch2,)
    assert jnp.allclose(out_f32, ref2, atol=2e-3), float(jnp.max(jnp.abs(out_f32 - ref2)))

    print("KERNEL_OK")
</pallas_src>

<mosaic_0001>
module attributes {stable_mosaic.version = 11 : i64} {
  func.func @kernel(%arg0: i32, %arg1: memref<8x128xbf16, #tpu.memory_space<vmem>>, %arg2: memref<128x128xbf16, #tpu.memory_space<vmem>>, %arg3: memref<1x128xf32, #tpu.memory_space<vmem>>, %arg4: memref<128x128xbf16, #tpu.memory_space<vmem>>, %arg5: memref<1x128xf32, #tpu.memory_space<vmem>>, %arg6: memref<128x128xbf16, #tpu.memory_space<vmem>>, %arg7: memref<1x128xf32, #tpu.memory_space<vmem>>, %arg8: memref<128x128xbf16, #tpu.memory_space<vmem>>, %arg9: memref<1x128xf32, #tpu.memory_space<vmem>>, %arg10: memref<128x1xf32, #tpu.memory_space<vmem>>, %arg11: memref<1x1xf32, #tpu.memory_space<vmem>>, %arg12: memref<1x1x8xf32, #tpu.memory_space<vmem>>) attributes {dimension_semantics = [#tpu.dimension_semantics<parallel>], iteration_bounds = array<i64: 1>, scalar_prefetch = 0 : i64, scratch_operands = 0 : i64, tpu.core_type = #tpu.core_type<tc>, window_params = [{transform_indices = @transform_0, window_bounds = array<i64: 8, 128>}, {pipeline_mode = #tpu.pipeline_mode<synchronous>, transform_indices = @transform_1, window_bounds = array<i64: 128, 128>}, {pipeline_mode = #tpu.pipeline_mode<synchronous>, transform_indices = @transform_2, window_bounds = array<i64: 1, 128>}, {pipeline_mode = #tpu.pipeline_mode<synchronous>, transform_indices = @transform_3, window_bounds = array<i64: 128, 128>}, {pipeline_mode = #tpu.pipeline_mode<synchronous>, transform_indices = @transform_4, window_bounds = array<i64: 1, 128>}, {pipeline_mode = #tpu.pipeline_mode<synchronous>, transform_indices = @transform_5, window_bounds = array<i64: 128, 128>}, {pipeline_mode = #tpu.pipeline_mode<synchronous>, transform_indices = @transform_6, window_bounds = array<i64: 1, 128>}, {pipeline_mode = #tpu.pipeline_mode<synchronous>, transform_indices = @transform_7, window_bounds = array<i64: 128, 128>}, {pipeline_mode = #tpu.pipeline_mode<synchronous>, transform_indices = @transform_8, window_bounds = array<i64: 1, 128>}, {pipeline_mode = #tpu.pipeline_mode<synchronous>, transform_indices = @transform_9, window_bounds = array<i64: 128, 1>}, {pipeline_mode = #tpu.pipeline_mode<synchronous>, transform_indices = @transform_10, window_bounds = array<i64: 1, 1>}, {transform_indices = @transform_11, window_bounds = array<i64: 1, 1, 8>}]} {
    %c0 = arith.constant 0 : index
    %c0_0 = arith.constant 0 : index
    %0 = vector.load %arg1[%c0, %c0_0] : memref<8x128xbf16, #tpu.memory_space<vmem>>, vector<8x128xbf16>
    %1 = arith.extf %0 : vector<8x128xbf16> to vector<8x128xf32>
    %c0_1 = arith.constant 0 : index
    %c0_2 = arith.constant 0 : index
    %2 = vector.load %arg2[%c0_1, %c0_2] : memref<128x128xbf16, #tpu.memory_space<vmem>>, vector<128x128xbf16>
    %c0_3 = arith.constant 0 : index
    %c0_4 = arith.constant 0 : index
    %3 = vector.load %arg3[%c0_3, %c0_4] : memref<1x128xf32, #tpu.memory_space<vmem>>, vector<1x128xf32>
    %c0_5 = arith.constant 0 : index
    %c0_6 = arith.constant 0 : index
    %4 = vector.load %arg4[%c0_5, %c0_6] : memref<128x128xbf16, #tpu.memory_space<vmem>>, vector<128x128xbf16>
    %c0_7 = arith.constant 0 : index
    %c0_8 = arith.constant 0 : index
    %5 = vector.load %arg5[%c0_7, %c0_8] : memref<1x128xf32, #tpu.memory_space<vmem>>, vector<1x128xf32>
    %cst = arith.constant dense<0.000000e+00> : vector<8x128xf32>
    %6 = tpu.matmul %0, %2, %cst {dimension_numbers = #tpu.dot_dimension_numbers<[1], [0], [0], [1], [0, 0, 1, 1], [], []>} : vector<8x128xbf16>, vector<128x128xbf16>, vector<8x128xf32> -> vector<8x128xf32>
    %7 = vector.broadcast %3 : vector<1x128xf32> to vector<8x128xf32>
    %8 = arith.addf %6, %7 : vector<8x128xf32>
    %cst_9 = arith.constant 0.000000e+00 : f32
    %9 = vector.broadcast %cst_9 : f32 to vector<8x128xf32>
    %10 = arith.maximumf %8, %9 : vector<8x128xf32>
    %11 = arith.truncf %10 : vector<8x128xf32> to vector<8x128xbf16>
    %cst_10 = arith.constant dense<0.000000e+00> : vector<8x128xf32>
    %12 = tpu.matmul %11, %4, %cst_10 {dimension_numbers = #tpu.dot_dimension_numbers<[1], [0], [0], [1], [0, 0, 1, 1], [], []>} : vector<8x128xbf16>, vector<128x128xbf16>, vector<8x128xf32> -> vector<8x128xf32>
    %13 = vector.broadcast %5 : vector<1x128xf32> to vector<8x128xf32>
    %14 = arith.addf %12, %13 : vector<8x128xf32>
    %15 = arith.addf %14, %1 : vector<8x128xf32>
    %cst_11 = arith.constant 0.000000e+00 : f32
    %16 = vector.broadcast %cst_11 : f32 to vector<8x128xf32>
    %17 = arith.maximumf %15, %16 : vector<8x128xf32>
    %c0_12 = arith.constant 0 : index
    %c0_13 = arith.constant 0 : index
    %18 = vector.load %arg6[%c0_12, %c0_13] : memref<128x128xbf16, #tpu.memory_space<vmem>>, vector<128x128xbf16>
    %c0_14 = arith.constant 0 : index
    %c0_15 = arith.constant 0 : index
    %19 = vector.load %arg7[%c0_14, %c0_15] : memref<1x128xf32, #tpu.memory_space<vmem>>, vector<1x128xf32>
    %c0_16 = arith.constant 0 : index
    %c0_17 = arith.constant 0 : index
    %20 = vector.load %arg8[%c0_16, %c0_17] : memref<128x128xbf16, #tpu.memory_space<vmem>>, vector<128x128xbf16>
    %c0_18 = arith.constant 0 : index
    %c0_19 = arith.constant 0 : index
    %21 = vector.load %arg9[%c0_18, %c0_19] : memref<1x128xf32, #tpu.memory_space<vmem>>, vector<1x128xf32>
    %22 = arith.truncf %17 : vector<8x128xf32> to vector<8x128xbf16>
    %cst_20 = arith.constant dense<0.000000e+00> : vector<8x128xf32>
    %23 = tpu.matmul %22, %18, %cst_20 {dimension_numbers = #tpu.dot_dimension_numbers<[1], [0], [0], [1], [0, 0, 1, 1], [], []>} : vector<8x128xbf16>, vector<128x128xbf16>, vector<8x128xf32> -> vector<8x128xf32>
    %24 = vector.broadcast %19 : vector<1x128xf32> to vector<8x128xf32>
    %25 = arith.addf %23, %24 : vector<8x128xf32>
    %cst_21 = arith.constant 0.000000e+00 : f32
    %26 = vector.broadcast %cst_21 : f32 to vector<8x128xf32>
    %27 = arith.maximumf %25, %26 : vector<8x128xf32>
    %28 = arith.truncf %27 : vector<8x128xf32> to vector<8x128xbf16>
    %cst_22 = arith.constant dense<0.000000e+00> : vector<8x128xf32>
    %29 = tpu.matmul %28, %20, %cst_22 {dimension_numbers = #tpu.dot_dimension_numbers<[1], [0], [0], [1], [0, 0, 1, 1], [], []>} : vector<8x128xbf16>, vector<128x128xbf16>, vector<8x128xf32> -> vector<8x128xf32>
    %30 = vector.broadcast %21 : vector<1x128xf32> to vector<8x128xf32>
    %31 = arith.addf %29, %30 : vector<8x128xf32>
    %32 = arith.addf %31, %17 : vector<8x128xf32>
    %cst_23 = arith.constant 0.000000e+00 : f32
    %33 = vector.broadcast %cst_23 : f32 to vector<8x128xf32>
    %34 = arith.maximumf %32, %33 : vector<8x128xf32>
    %c0_24 = arith.constant 0 : index
    %c0_25 = arith.constant 0 : index
    %35 = vector.load %arg10[%c0_24, %c0_25] : memref<128x1xf32, #tpu.memory_space<vmem>>, vector<128x1xf32>
    %c0_26 = arith.constant 0 : index
    %c0_27 = arith.constant 0 : index
    %36 = vector.load %arg11[%c0_26, %c0_27] : memref<1x1xf32, #tpu.memory_space<vmem>>, vector<1x1xf32>
    %37 = tpu.transpose %34, [1, 0] : vector<8x128xf32> -> vector<128x8xf32>
    %38 = vector.broadcast %35 : vector<128x1xf32> to vector<128x8xf32>
    %39 = arith.mulf %37, %38 : vector<128x8xf32>
    %cst_28 = arith.constant dense<0.000000e+00> : vector<8xf32>
    %40 = vector.multi_reduction <add>, %39, %cst_28 [0] : vector<128x8xf32> to vector<8xf32>
    %41 = vector.shape_cast %40 : vector<8xf32> to vector<1x8xf32>
    %42 = vector.broadcast %36 : vector<1x1xf32> to vector<1x8xf32>
    %43 = arith.addf %41, %42 : vector<1x8xf32>
    %44 = arith.negf %43 : vector<1x8xf32>
    %45 = math.exp %44 : vector<1x8xf32>
    %cst_29 = arith.constant 1.000000e+00 : f32
    %46 = vector.broadcast %cst_29 : f32 to vector<1x8xf32>
    %47 = arith.addf %46, %45 : vector<1x8xf32>
    %48 = arith.divf %46, %47 : vector<1x8xf32>
    %c0_30 = arith.constant 0 : index
    %c0_31 = arith.constant 0 : index
    %c0_32 = arith.constant 0 : index
    %49 = vector.load %arg12[%c0_30, %c0_31, %c0_32] : memref<1x1x8xf32, #tpu.memory_space<vmem>>, vector<1x1x8xf32>
    %50 = vector.shape_cast %49 : vector<1x1x8xf32> to vector<1x8xf32>
    %51 = vector.shape_cast %48 : vector<1x8xf32> to vector<1x1x8xf32>
    tpu.vector_store %arg12[%c0_30, %c0_31, %c0_32], %51 {strides = array<i32>} : memref<1x1x8xf32, #tpu.memory_space<vmem>>, vector<1x1x8xf32>,
    return
  }
  func.func @transform_0(%arg0: i32) -> (i32, i32) {
    %c0_i32 = arith.constant 0 : i32
    %c0_i32_0 = arith.constant 0 : i32
    return %arg0, %c0_i32 : i32, i32
  }
  func.func @transform_1(%arg0: i32) -> (i32, i32) {
    %c0_i32 = arith.constant 0 : i32
    %c0_i32_0 = arith.constant 0 : i32
    %c0_i32_1 = arith.constant 0 : i32
    return %c0_i32, %c0_i32_0 : i32, i32
  }
  func.func @transform_2(%arg0: i32) -> (i32, i32) {
    %c0_i32 = arith.constant 0 : i32
    %c0_i32_0 = arith.constant 0 : i32
    %c0_i32_1 = arith.constant 0 : i32
    return %c0_i32, %c0_i32_0 : i32, i32
  }
  func.func @transform_3(%arg0: i32) -> (i32, i32) {
    %c0_i32 = arith.constant 0 : i32
    %c0_i32_0 = arith.constant 0 : i32
    %c0_i32_1 = arith.constant 0 : i32
    return %c0_i32, %c0_i32_0 : i32, i32
  }
  func.func @transform_4(%arg0: i32) -> (i32, i32) {
    %c0_i32 = arith.constant 0 : i32
    %c0_i32_0 = arith.constant 0 : i32
    %c0_i32_1 = arith.constant 0 : i32
    return %c0_i32, %c0_i32_0 : i32, i32
  }
  func.func @transform_5(%arg0: i32) -> (i32, i32) {
    %c0_i32 = arith.constant 0 : i32
    %c0_i32_0 = arith.constant 0 : i32
    %c0_i32_1 = arith.constant 0 : i32
    return %c0_i32, %c0_i32_0 : i32, i32
  }
  func.func @transform_6(%arg0: i32) -> (i32, i32) {
    %c0_i32 = arith.constant 0 : i32
    %c0_i32_0 = arith.constant 0 : i32
    %c0_i32_1 = arith.constant 0 : i32
    return %c0_i32, %c0_i32_0 : i32, i32
  }
  func.func @transform_7(%arg0: i32) -> (i32, i32) {
    %c0_i32 = arith.constant 0 : i32
    %c0_i32_0 = arith.constant 0 : i32
    %c0_i32_1 = arith.constant 0 : i32
    return %c0_i32, %c0_i32_0 : i32, i32
  }
  func.func @transform_8(%arg0: i32) -> (i32, i32) {
    %c0_i32 = arith.constant 0 : i32
    %c0_i32_0 = arith.constant 0 : i32
    %c0_i32_1 = arith.constant 0 : i32
    return %c0_i32, %c0_i32_0 : i32, i32
  }
  func.func @transform_9(%arg0: i32) -> (i32, i32) {
    %c0_i32 = arith.constant 0 : i32
    %c0_i32_0 = arith.constant 0 : i32
    %c0_i32_1 = arith.constant 0 : i32
    return %c0_i32, %c0_i32_0 : i32, i32
  }
  func.func @transform_10(%arg0: i32) -> (i32, i32) {
    %c0_i32 = arith.constant 0 : i32
    %c0_i32_0 = arith.constant 0 : i32
    %c0_i32_1 = arith.constant 0 : i32
    return %c0_i32, %c0_i32_0 : i32, i32
  }
  func.func @transform_11(%arg0: i32) -> (i32, i32, i32) {
    %c0_i32 = arith.constant 0 : i32
    %c0_i32_0 = arith.constant 0 : i32
    %c0_i32_1 = arith.constant 0 : i32
    return %arg0, %c0_i32, %c0_i32_0 : i32, i32, i32
  }
}

module attributes {stable_mosaic.version = 11 : i64} {
  func.func @kernel(%arg0: i32, %arg1: memref<8x128xbf16, #tpu.memory_space<vmem>>, %arg2: memref<128x128xbf16, #tpu.memory_space<vmem>>, %arg3: memref<1x128xf32, #tpu.memory_space<vmem>>, %arg4: memref<128x128xbf16, #tpu.memory_space<vmem>>, %arg5: memref<1x128xf32, #tpu.memory_space<vmem>>, %arg6: memref<128x128xbf16, #tpu.memory_space<vmem>>, %arg7: memref<1x128xf32, #tpu.memory_space<vmem>>, %arg8: memref<128x128xbf16, #tpu.memory_space<vmem>>, %arg9: memref<1x128xf32, #tpu.memory_space<vmem>>, %arg10: memref<128x1xf32, #tpu.memory_space<vmem>>, %arg11: memref<1x1xf32, #tpu.memory_space<vmem>>, %arg12: memref<1x1x8xf32, #tpu.memory_space<vmem>>) attributes {dimension_semantics = [#tpu.dimension_semantics<parallel>], iteration_bounds = array<i64: 1>, scalar_prefetch = 0 : i64, scratch_operands = 0 : i64, tpu.core_type = #tpu.core_type<tc>, window_params = [{transform_indices = @transform_0, window_bounds = array<i64: 8, 128>}, {pipeline_mode = #tpu.pipeline_mode<synchronous>, transform_indices = @transform_1, window_bounds = array<i64: 128, 128>}, {pipeline_mode = #tpu.pipeline_mode<synchronous>, transform_indices = @transform_2, window_bounds = array<i64: 1, 128>}, {pipeline_mode = #tpu.pipeline_mode<synchronous>, transform_indices = @transform_3, window_bounds = array<i64: 128, 128>}, {pipeline_mode = #tpu.pipeline_mode<synchronous>, transform_indices = @transform_4, window_bounds = array<i64: 1, 128>}, {pipeline_mode = #tpu.pipeline_mode<synchronous>, transform_indices = @transform_5, window_bounds = array<i64: 128, 128>}, {pipeline_mode = #tpu.pipeline_mode<synchronous>, transform_indices = @transform_6, window_bounds = array<i64: 1, 128>}, {pipeline_mode = #tpu.pipeline_mode<synchronous>, transform_indices = @transform_7, window_bounds = array<i64: 128, 128>}, {pipeline_mode = #tpu.pipeline_mode<synchronous>, transform_indices = @transform_8, window_bounds = array<i64: 1, 128>}, {pipeline_mode = #tpu.pipeline_mode<synchronous>, transform_indices = @transform_9, window_bounds = array<i64: 128, 1>}, {pipeline_mode = #tpu.pipeline_mode<synchronous>, transform_indices = @transform_10, window_bounds = array<i64: 1, 1>}, {transform_indices = @transform_11, window_bounds = array<i64: 1, 1, 8>}]} {
    %c0 = arith.constant 0 : index
    %c0_0 = arith.constant 0 : index
    %0 = vector.load %arg1[%c0, %c0_0] : memref<8x128xbf16, #tpu.memory_space<vmem>>, vector<8x128xbf16>
    %1 = arith.extf %0 : vector<8x128xbf16> to vector<8x128xf32>
    %c0_1 = arith.constant 0 : index
    %c0_2 = arith.constant 0 : index
    %2 = vector.load %arg2[%c0_1, %c0_2] : memref<128x128xbf16, #tpu.memory_space<vmem>>, vector<128x128xbf16>
    %c0_3 = arith.constant 0 : index
    %c0_4 = arith.constant 0 : index
    %3 = vector.load %arg3[%c0_3, %c0_4] : memref<1x128xf32, #tpu.memory_space<vmem>>, vector<1x128xf32>
    %c0_5 = arith.constant 0 : index
    %c0_6 = arith.constant 0 : index
    %4 = vector.load %arg4[%c0_5, %c0_6] : memref<128x128xbf16, #tpu.memory_space<vmem>>, vector<128x128xbf16>
    %c0_7 = arith.constant 0 : index
    %c0_8 = arith.constant 0 : index
    %5 = vector.load %arg5[%c0_7, %c0_8] : memref<1x128xf32, #tpu.memory_space<vmem>>, vector<1x128xf32>
    %cst = arith.constant dense<0.000000e+00> : vector<8x128xf32>
    %6 = tpu.matmul %0, %2, %cst {dimension_numbers = #tpu.dot_dimension_numbers<[1], [0], [0], [1], [0, 0, 1, 1], [], []>} : vector<8x128xbf16>, vector<128x128xbf16>, vector<8x128xf32> -> vector<8x128xf32>
    %7 = vector.broadcast %3 : vector<1x128xf32> to vector<8x128xf32>
    %8 = arith.addf %6, %7 : vector<8x128xf32>
    %cst_9 = arith.constant 0.000000e+00 : f32
    %9 = vector.broadcast %cst_9 : f32 to vector<8x128xf32>
    %10 = arith.maximumf %8, %9 : vector<8x128xf32>
    %11 = arith.truncf %10 : vector<8x128xf32> to vector<8x128xbf16>
    %cst_10 = arith.constant dense<0.000000e+00> : vector<8x128xf32>
    %12 = tpu.matmul %11, %4, %cst_10 {dimension_numbers = #tpu.dot_dimension_numbers<[1], [0], [0], [1], [0, 0, 1, 1], [], []>} : vector<8x128xbf16>, vector<128x128xbf16>, vector<8x128xf32> -> vector<8x128xf32>
    %13 = vector.broadcast %5 : vector<1x128xf32> to vector<8x128xf32>
    %14 = arith.addf %12, %13 : vector<8x128xf32>
    %15 = arith.addf %14, %1 : vector<8x128xf32>
    %cst_11 = arith.constant 0.000000e+00 : f32
    %16 = vector.broadcast %cst_11 : f32 to vector<8x128xf32>
    %17 = arith.maximumf %15, %16 : vector<8x128xf32>
    %c0_12 = arith.constant 0 : index
    %c0_13 = arith.constant 0 : index
    %18 = vector.load %arg6[%c0_12, %c0_13] : memref<128x128xbf16, #tpu.memory_space<vmem>>, vector<128x128xbf16>
    %c0_14 = arith.constant 0 : index
    %c0_15 = arith.constant 0 : index
    %19 = vector.load %arg7[%c0_14, %c0_15] : memref<1x128xf32, #tpu.memory_space<vmem>>, vector<1x128xf32>
    %c0_16 = arith.constant 0 : index
    %c0_17 = arith.constant 0 : index
    %20 = vector.load %arg8[%c0_16, %c0_17] : memref<128x128xbf16, #tpu.memory_space<vmem>>, vector<128x128xbf16>
    %c0_18 = arith.constant 0 : index
    %c0_19 = arith.constant 0 : index
    %21 = vector.load %arg9[%c0_18, %c0_19] : memref<1x128xf32, #tpu.memory_space<vmem>>, vector<1x128xf32>
    %22 = arith.truncf %17 : vector<8x128xf32> to vector<8x128xbf16>
    %cst_20 = arith.constant dense<0.000000e+00> : vector<8x128xf32>
    %23 = tpu.matmul %22, %18, %cst_20 {dimension_numbers = #tpu.dot_dimension_numbers<[1], [0], [0], [1], [0, 0, 1, 1], [], []>} : vector<8x128xbf16>, vector<128x128xbf16>, vector<8x128xf32> -> vector<8x128xf32>
    %24 = vector.broadcast %19 : vector<1x128xf32> to vector<8x128xf32>
    %25 = arith.addf %23, %24 : vector<8x128xf32>
    %cst_21 = arith.constant 0.000000e+00 : f32
    %26 = vector.broadcast %cst_21 : f32 to vector<8x128xf32>
    %27 = arith.maximumf %25, %26 : vector<8x128xf32>
    %28 = arith.truncf %27 : vector<8x128xf32> to vector<8x128xbf16>
    %cst_22 = arith.constant dense<0.000000e+00> : vector<8x128xf32>
    %29 = tpu.matmul %28, %20, %cst_22 {dimension_numbers = #tpu.dot_dimension_numbers<[1], [0], [0], [1], [0, 0, 1, 1], [], []>} : vector<8x128xbf16>, vector<128x128xbf16>, vector<8x128xf32> -> vector<8x128xf32>
    %30 = vector.broadcast %21 : vector<1x128xf32> to vector<8x128xf32>
    %31 = arith.addf %29, %30 : vector<8x128xf32>
    %32 = arith.addf %31, %17 : vector<8x128xf32>
    %cst_23 = arith.constant 0.000000e+00 : f32
    %33 = vector.broadcast %cst_23 : f32 to vector<8x128xf32>
    %34 = arith.maximumf %32, %33 : vector<8x128xf32>
    %c0_24 = arith.constant 0 : index
    %c0_25 = arith.constant 0 : index
    %35 = vector.load %arg10[%c0_24, %c0_25] : memref<128x1xf32, #tpu.memory_space<vmem>>, vector<128x1xf32>
    %c0_26 = arith.constant 0 : index
    %c0_27 = arith.constant 0 : index
    %36 = vector.load %arg11[%c0_26, %c0_27] : memref<1x1xf32, #tpu.memory_space<vmem>>, vector<1x1xf32>
    %37 = tpu.transpose %34, [1, 0] : vector<8x128xf32> -> vector<128x8xf32>
    %38 = vector.broadcast %35 : vector<128x1xf32> to vector<128x8xf32>
    %39 = arith.mulf %37, %38 : vector<128x8xf32>
    %cst_28 = arith.constant dense<0.000000e+00> : vector<8xf32>
    %40 = vector.multi_reduction <add>, %39, %cst_28 [0] : vector<128x8xf32> to vector<8xf32>
    %41 = vector.shape_cast %40 : vector<8xf32> to vector<1x8xf32>
    %42 = vector.broadcast %36 : vector<1x1xf32> to vector<1x8xf32>
    %43 = arith.addf %41, %42 : vector<1x8xf32>
    %44 = arith.negf %43 : vector<1x8xf32>
    %45 = math.exp %44 : vector<1x8xf32>
    %cst_29 = arith.constant 1.000000e+00 : f32
    %46 = vector.broadcast %cst_29 : f32 to vector<1x8xf32>
    %47 = arith.addf %46, %45 : vector<1x8xf32>
    %48 = arith.divf %46, %47 : vector<1x8xf32>
    %c0_30 = arith.constant 0 : index
    %c0_31 = arith.constant 0 : index
    %c0_32 = arith.constant 0 : index
    %49 = vector.load %arg12[%c0_30, %c0_31, %c0_32] : memref<1x1x8xf32, #tpu.memory_space<vmem>>, vector<1x1x8xf32>
    %50 = vector.shape_cast %49 : vector<1x1x8xf32> to vector<1x8xf32>
    %51 = vector.shape_cast %48 : vector<1x8xf32> to vector<1x1x8xf32>
    tpu.vector_store %arg12[%c0_30, %c0_31, %c0_32], %51 {strides = array<i32>} : memref<1x1x8xf32, #tpu.memory_space<vmem>>, vector<1x1x8xf32>,
    return
  }
  func.func @transform_0(%arg0: i32) -> (i32, i32) {
    %c0_i32 = arith.constant 0 : i32
    %c0_i32_0 = arith.constant 0 : i32
    return %arg0, %c0_i32 : i32, i32
  }
  func.func @transform_1(%arg0: i32) -> (i32, i32) {
    %c0_i32 = arith.constant 0 : i32
    %c0_i32_0 = arith.constant 0 : i32
    %c0_i32_1 = arith.constant 0 : i32
    return %c0_i32, %c0_i32_0 : i32, i32
  }
  func.func @transform_2(%arg0: i32) -> (i32, i32) {
    %c0_i32 = arith.constant 0 : i32
    %c0_i32_0 = arith.constant 0 : i32
    %c0_i32_1 = arith.constant 0 : i32
    return %c0_i32, %c0_i32_0 : i32, i32
  }
  func.func @transform_3(%arg0: i32) -> (i32, i32) {
    %c0_i32 = arith.constant 0 : i32
    %c0_i32_0 = arith.constant 0 : i32
    %c0_i32_1 = arith.constant 0 : i32
    return %c0_i32, %c0_i32_0 : i32, i32
  }
  func.func @transform_4(%arg0: i32) -> (i32, i32) {
    %c0_i32 = arith.constant 0 : i32
    %c0_i32_0 = arith.constant 0 : i32
    %c0_i32_1 = arith.constant 0 : i32
    return %c0_i32, %c0_i32_0 : i32, i32
  }
  func.func @transform_5(%arg0: i32) -> (i32, i32) {
    %c0_i32 = arith.constant 0 : i32
    %c0_i32_0 = arith.constant 0 : i32
    %c0_i32_1 = arith.constant 0 : i32
    return %c0_i32, %c0_i32_0 : i32, i32
  }
  func.func @transform_6(%arg0: i32) -> (i32, i32) {
    %c0_i32 = arith.constant 0 : i32
    %c0_i32_0 = arith.constant 0 : i32
    %c0_i32_1 = arith.constant 0 : i32
    return %c0_i32, %c0_i32_0 : i32, i32
  }
  func.func @transform_7(%arg0: i32) -> (i32, i32) {
    %c0_i32 = arith.constant 0 : i32
    %c0_i32_0 = arith.constant 0 : i32
    %c0_i32_1 = arith.constant 0 : i32
    return %c0_i32, %c0_i32_0 : i32, i32
  }
  func.func @transform_8(%arg0: i32) -> (i32, i32) {
    %c0_i32 = arith.constant 0 : i32
    %c0_i32_0 = arith.constant 0 : i32
    %c0_i32_1 = arith.constant 0 : i32
    return %c0_i32, %c0_i32_0 : i32, i32
  }
  func.func @transform_9(%arg0: i32) -> (i32, i32) {
    %c0_i32 = arith.constant 0 : i32
    %c0_i32_0 = arith.constant 0 : i32
    %c0_i32_1 = arith.constant 0 : i32
    return %c0_i32, %c0_i32_0 : i32, i32
  }
  func.func @transform_10(%arg0: i32) -> (i32, i32) {
    %c0_i32 = arith.constant 0 : i32
    %c0_i32_0 = arith.constant 0 : i32
    %c0_i32_1 = arith.constant 0 : i32
    return %c0_i32, %c0_i32_0 : i32, i32
  }
  func.func @transform_11(%arg0: i32) -> (i32, i32, i32) {
    %c0_i32 = arith.constant 0 : i32
    %c0_i32_0 = arith.constant 0 : i32
    %c0_i32_1 = arith.constant 0 : i32
    return %arg0, %c0_i32, %c0_i32_0 : i32, i32, i32
  }
}

</mosaic_0001>

<bundles_post_ra>
// kernel: tpu_custom_call.1
= control target key start
LH: loop header
LB: loop body
LE: loop exit
PB: predicated region body
PF: predicated region fallthrough
CT: control target
= control target key end

     0   :  { %s1291_s0 = inlined_call_operand.hbm [shape: bf16[8,128], index: 0, kind: input, shape index: {}]   ;;  %s1292_s1 = inlined_call_operand.vmem [shape: bf16[128,128], index: 1, kind: input, shape index: {}]   ;;  %s1293_s2 = inlined_call_operand.vmem [shape: f32[1,128], index: 2, kind: input, shape index: {}]   ;;  %s1294_s3 = inlined_call_operand.vmem [shape: bf16[128,128], index: 3, kind: input, shape index: {}]   ;;  %s1295_s4 = inlined_call_operand.vmem [shape: f32[1,128], index: 4, kind: input, shape index: {}]   ;;  %s1296_s5 = inlined_call_operand.hbm [shape: bf16[128,128], index: 5, kind: input, shape index: {}]   ;;  %s1297_s6 = inlined_call_operand.vmem [shape: f32[1,128], index: 6, kind: input, shape index: {}]   ;;  %s1298_s7 = inlined_call_operand.hbm [shape: bf16[128,128], index: 7, kind: input, shape index: {}]   ;;  %s1299_s8 = inlined_call_operand.vmem [shape: f32[1,128], index: 8, kind: input, shape index: {}]   ;;  %s1300_s9 = inlined_call_operand.vmem [shape: f32[128,1], index: 9, kind: input, shape index: {}]   ;;  %s1301_s10 = inlined_call_operand.<no memory space> [shape: f32[1,1], index: 10, kind: input, shape index: {}]   ;;  %s1302_s11 = inlined_call_operand.hbm [shape: f32[1,1,8], index: 11, kind: output, shape index: {}]  }
   0x1   :  { %v16_v0 = vstv %s1301_s10 }
   0x2   :  { %17 = vst [vmem:[#allocation2] sm:$0x1] %v16_v0 }
   0x3   :  { %18 = vsyncpa [#allocation4], 0 }
   0x4   :  { %19 = vsyncpa [#allocation7], 0 }
   0x5   :  { %20 = vsyncpa [#allocation5], 0  ;;  %s1039_s19 = smov [#allocation6]  }
   0x6   :  { %s44_s20 = sshll.u32 %s1039_s19, 4  ;;  %s45_s20 = int_to_ptr.vmem [resolvable:$true] %s44_s20 }
   0x7   :  { %s961_s21 = scalar_lea.vmem %s45_s20, 1024  ;;  %p966_p1 = scmp.lt.s32.totalorder %s45_s20, %s45_s20 }
   0x8   :  { %p962_p0 = scmp.ne.s32.totalorder %s45_s20, %s961_s21  ;;  %p967_p2 = scmp.lt.s32.totalorder %s961_s21, %s961_s21 }
   0xa   :  { %p968_p3 = por %p967_p2, %p966_p1 }
   0xc   :  { %p969_p4 = pnand %p968_p3, %p962_p0 }
   0xe   :  { %972 = shalt.err (!%p969_p4)
}
   0xf   :  { %s1040_s22 = smov 64   ;;  %s1041_s23 = smov 4  }
  0x10   :  { %50 = dma.hbm_to_vmem [thread:$0]  %s1296_s5, 1024, %s45_s20, [#allocation7], %s1040_s22, %s1040_s22, %s1041_s23  }
  0x11   :  { %s1042_s10 = smov [#allocation3]   ;;  %s1043_s27 = smov [#allocation8]  }
  0x12   :  { %s27_s26 = sshll.u32 %s1042_s10, 4  ;;  %s58_s28 = sshll.u32 %s1043_s27, 4  ;;  %s28_s26 = int_to_ptr.vmem [resolvable:$true] %s27_s26  ;;  %s59_s28 = int_to_ptr.vmem [resolvable:$true] %s58_s28 }
  0x13   :  { %s981_s29 = scalar_lea.vmem %s28_s26, 64  ;;  %p986_p6 = scmp.lt.s32.totalorder %s28_s26, %s28_s26 }
  0x14   :  { %p982_p5 = scmp.ne.s32.totalorder %s28_s26, %s981_s29  ;;  %p987_p7 = scmp.lt.s32.totalorder %s981_s29, %s981_s29 }
  0x16   :  { %p988_p8 = por %p987_p7, %p986_p6 }
  0x18   :  { %p989_p9 = pnand %p988_p8, %p982_p5 }
  0x1a   :  { %992 = shalt.err (!%p989_p9)
}
  0x1b   :  { %30 = dma.hbm_to_vmem [thread:$0]  %s1291_s0, 64, %s28_s26, [#allocation4]  }
  0x1c   :  { %s1001_s13 = scalar_lea.vmem %s59_s28, 1024  ;;  %p1006_p11 = scmp.lt.s32.totalorder %s59_s28, %s59_s28 }
  0x1d   :  { %p1002_p10 = scmp.ne.s32.totalorder %s59_s28, %s1001_s13  ;;  %p1007_p12 = scmp.lt.s32.totalorder %s1001_s13, %s1001_s13 }
  0x1f   :  { %p1008_p13 = por %p1007_p12, %p1006_p11 }
  0x21   :  { %p1009_p0 = pnand %p1008_p13, %p1002_p10 }
  0x23   :  { %1012 = shalt.err (!%p1009_p0)
}
  0x24   :  { %64 = dma.hbm_to_vmem [thread:$0]  %s1298_s7, 1024, %s59_s28, [#allocation7], %s1040_s22, %s1040_s22, %s1041_s23  }
  0x25   :  { %1033 = dma.done.wait [#allocation4], 64  }
  0x26   :  { %1034 = vsyncadd [#allocation4], 4294967232 }
  0x27   :  { %1035 = dma.done.wait [#allocation7], 2048  }
  0x28   :  { %1036 = vsyncadd [#allocation7], 4294965248  ;;  %v1044_v1 = vmov 0.0   ;;  %vm1045_vm0 = vmmov 0   ;;  %v917_v2 = vld [vmem:[%s1292_s1 + $0x38] sm:$0xff]   ;;  %v918_v3 = vld [vmem:[%s1292_s1 + $0x30] sm:$0xff]  }
  0x29   :  { %826 = vmatprep.subr.bf16.mxu0 %v1044_v1  ;;  %842 = vmatprep.mubr.msk.bf16.mxu0 %vm1045_vm0, %v1044_v1  ;;  %v919_v4 = vld [vmem:[%s1292_s1 + $0x28] sm:$0xff]   ;;  %v925_v5 = vld [vmem:[%s1294_s3 + $0x38] sm:$0xff]   ;;  %v920_v6 = vld [vmem:[%s1292_s1 + $0x20] sm:$0xff]   ;;  %v1046_v54 = vmov 0   ;;  %vm681_vm1 = vcmask 64512   ;;  %vm735_vm2 = vcmask 57344  }
  0x2a   :  { %846 = vmatprep.subr.bf16.mxu1 %v1044_v1  ;;  %862 = vmatprep.mubr.msk.bf16.mxu1 %vm1045_vm0, %v1044_v1  ;;  %v926_v7 = vld [vmem:[%s1294_s3 + $0x30] sm:$0xff]   ;;  %v921_v8 = vld [vmem:[%s1292_s1 + $0x18] sm:$0xff]   ;;  %v927_v9 = vld [vmem:[%s1294_s3 + $0x28] sm:$0xff]  }
  0x2b   :  { %827 = vmatpush3.bf16.msra.mxu0 %v917_v2  ;;  %847 = vmatpush3.bf16.msra.mxu1 %v925_v5  ;;  %v922_v10 = vld [vmem:[%s1292_s1 + $0x10] sm:$0xff]   ;;  %v928_v11 = vld [vmem:[%s1294_s3 + $0x20] sm:$0xff]   ;;  %v923_v12 = vld [vmem:[%s1292_s1 + $0x8] sm:$0xff]  }
  0x2c   :  { %828 = vmatprep.subr.bf16.mxu0 %v1044_v1  ;;  %848 = vmatprep.subr.bf16.mxu1 %v1044_v1  ;;  %v929_v13 = vld [vmem:[%s1294_s3 + $0x18] sm:$0xff]   ;;  %v924_v14 = vld [vmem:[%s1292_s1] sm:$0xff]   ;;  %v930_v15 = vld [vmem:[%s1294_s3 + $0x10] sm:$0xff]  }
  0x2d   :  { %v1180_v16 = vld [vmem:[#allocation3] sm:$0xf]  ;;  %v931_v17 = vld [vmem:[%s1294_s3 + $0x8] sm:$0xff]   ;;  %v934_v20 = vld [vmem:[#allocation6 + $0x30] sm:$0xff]   ;;  %916 = vset.pattern.permute.xlu1 %v1046_v54  ;;  %915 = vset.pattern.permute.xlu0 %v1046_v54 }
  0x2e   :  { %v932_v18 = vld [vmem:[%s1294_s3] sm:$0xff]   ;;  %v935_v21 = vld [vmem:[#allocation6 + $0x28] sm:$0xff]   ;;  %v938_v24 = vld [vmem:[#allocation6 + $0x10] sm:$0xff]   ;;  %v82_v42 = vunpack.c.l.bf16 %v1180_v16 }
  0x2f   :  { %829 = vmatpush3.bf16.msra.mxu0 %v918_v3  ;;  %849 = vmatpush3.bf16.msra.mxu1 %v926_v7  ;;  %v933_v19 = vld [vmem:[#allocation6 + $0x38] sm:$0xff]   ;;  %v936_v22 = vld [vmem:[#allocation6 + $0x20] sm:$0xff]   ;;  %v939_v33 = vld [vmem:[#allocation6 + $0x8] sm:$0xff]  }
  0x30   :  { %830 = vmatprep.subr.bf16.mxu0 %v1044_v1  ;;  %850 = vmatprep.subr.bf16.mxu1 %v1044_v1  ;;  %v937_v23 = vld [vmem:[#allocation6 + $0x18] sm:$0xff]   ;;  %v940_v34 = vld [vmem:[#allocation6] sm:$0xff]   ;;  %v942_v36 = vld [vmem:[#allocation8 + $0x30] sm:$0xff]  }
  0x31   :  { %v753_v25 = vld [vmem:[%s1293_s2] ss:$0 sm:$0xff]  ;;  %v943_v37 = vld [vmem:[#allocation8 + $0x28] sm:$0xff]   ;;  %v944_v38 = vld [vmem:[#allocation8 + $0x20] sm:$0xff]  }
  0x32   :  { %v941_v35 = vld [vmem:[#allocation8 + $0x38] sm:$0xff]   ;;  %v946_v40 = vld [vmem:[#allocation8 + $0x10] sm:$0xff]   ;;  %v947_v51 = vld [vmem:[#allocation8 + $0x8] sm:$0xff]  }
  0x33   :  { %831 = vmatpush3.bf16.msra.mxu0 %v919_v4  ;;  %851 = vmatpush3.bf16.msra.mxu1 %v927_v9  ;;  %v945_v39 = vld [vmem:[#allocation8 + $0x18] sm:$0xff]   ;;  %v948_v52 = vld [vmem:[#allocation8] sm:$0xff]   ;;  %v538_v53 = vld [vmem:[%s1300_s9 + $0x10] sm:$0xff] }
  0x34   :  { %832 = vmatprep.subr.bf16.mxu0 %v1044_v1  ;;  %852 = vmatprep.subr.bf16.mxu1 %v1044_v1  ;;  %v762_v41 = vld [vmem:[%s1295_s4] ss:$0 sm:$0xff]  ;;  %v539_v56 = vld [vmem:[%s1300_s9 + $0x18] sm:$0xff]  ;;  %v541_v57 = vld [vmem:[%s1300_s9 + $0x28] sm:$0xff] }
  0x35   :  { %597 = vperm.xlu1 %916, %v538_v53   ;;  %v536_v55 = vld [vmem:[%s1300_s9] sm:$0xff]  ;;  %v543_v58 = vld [vmem:[%s1300_s9 + $0x38] sm:$0xff]  ;;  %v545_v59 = vld [vmem:[%s1300_s9 + $0x48] sm:$0xff] }
  0x36   :  { %587 = vperm.xlu0 %915, %v536_v55   ;;  %v547_v60 = vld [vmem:[%s1300_s9 + $0x58] sm:$0xff]  ;;  %v549_v61 = vld [vmem:[%s1300_s9 + $0x68] sm:$0xff]  ;;  %v771_v62 = vld [vmem:[%s1297_s6] ss:$0 sm:$0xff] }
  0x37   :  { %833 = vmatpush3.bf16.msra.mxu0 %v920_v6  ;;  %853 = vmatpush3.bf16.msra.mxu1 %v928_v11  ;;  %v537_v6 = vld [vmem:[%s1300_s9 + $0x8] sm:$0xff]  ;;  %v540_v7 = vld [vmem:[%s1300_s9 + $0x20] sm:$0xff] }
  0x38   :  { %834 = vmatprep.subr.bf16.mxu0 %v1044_v1  ;;  %854 = vmatprep.subr.bf16.mxu1 %v1044_v1  ;;  %v544_v9 = vld [vmem:[%s1300_s9 + $0x40] sm:$0xff] }
  0x39   :  { %602 = vperm.xlu1 %916, %v539_v56   ;;  %v548_v11 = vld [vmem:[%s1300_s9 + $0x60] sm:$0xff] }
  0x3a   :  { %592 = vperm.xlu0 %915, %v537_v6  }
  0x3b   :  { %835 = vmatpush3.bf16.msra.mxu0 %v921_v8  ;;  %855 = vmatpush3.bf16.msra.mxu1 %v929_v13  ;;  %v542_v8 = vld [vmem:[%s1300_s9 + $0x30] sm:$0xff]  ;;  %v551_v13 = vld [vmem:[%s1300_s9 + $0x78] sm:$0xff] }
  0x3c   :  { %836 = vmatprep.subr.bf16.mxu0 %v1044_v1  ;;  %856 = vmatprep.subr.bf16.mxu1 %v1044_v1 }
  0x3d   :  { %612 = vperm.xlu1 %916, %v541_v57  }
  0x3e   :  { %607 = vperm.xlu0 %915, %v540_v7  }
  0x3f   :  { %837 = vmatpush3.bf16.msra.mxu0 %v922_v10  ;;  %857 = vmatpush3.bf16.msra.mxu1 %v930_v15  ;;  %v546_v10 = vld [vmem:[%s1300_s9 + $0x50] sm:$0xff]  ;;  %v780_v15 = vld [vmem:[%s1299_s8] ss:$0 sm:$0xff]  ;;  %s1047_s8 = smov [#allocation9]  }
  0x40   :  { %838 = vmatprep.subr.bf16.mxu0 %v1044_v1  ;;  %858 = vmatprep.subr.bf16.mxu1 %v1044_v1 }
  0x41   :  { %622 = vperm.xlu1 %916, %v543_v58  }
  0x42   :  { %617 = vperm.xlu0 %915, %v542_v8  }
  0x43   :  { %839 = vmatpush3.bf16.msra.mxu0 %v923_v12  ;;  %859 = vmatpush3.bf16.msra.mxu1 %v931_v17  ;;  %v550_v12 = vld [vmem:[%s1300_s9 + $0x70] sm:$0xff]  ;;  %s743_s9 = sshll.u32 %s1047_s8, 4  ;;  %s744_s9 = int_to_ptr.vmem [resolvable:$true] %s743_s9 }
  0x44   :  { %840 = vmatprep.subr.bf16.mxu0 %v1044_v1  ;;  %860 = vmatprep.subr.bf16.mxu1 %v1044_v1  ;;  %s1013_s29 = scalar_lea.vmem %s744_s9, 16  ;;  %s1017_s30 = scalar_lea.vmem %s744_s9, 32 }
  0x45   :  { %632 = vperm.xlu1 %916, %v545_v59   ;;  %p1014_p1 = scmp.ne.s32.totalorder %s744_s9, %s1013_s29  ;;  %p1018_p2 = scmp.lt.s32.totalorder %s744_s9, %s744_s9 }
  0x46   :  { %627 = vperm.xlu0 %915, %v544_v9   ;;  %p1019_p3 = scmp.lt.s32.totalorder %s1017_s30, %s1013_s29 }
  0x47   :  { %841 = vmatpush3.bf16.msra.mxu0 %v924_v14  ;;  %861 = vmatpush3.bf16.msra.mxu1 %v932_v18  ;;  %v552_v14 = vld [vmem:[#allocation2] sm:$0x1] }
  0x48   :  { %866 = vmatprep.subr.bf16.mxu0 %v1044_v1  ;;  %886 = vmatprep.subr.bf16.mxu1 %v1044_v1  ;;  %p1020_p4 = por %p1019_p3, %p1018_p2 }
  0x49   :  { %642 = vperm.xlu1 %916, %v547_v60  }
  0x4a   :  { %843 = vmatmul.mubr.bf16.vlgmr.msra.gmra.mxu0 %v1180_v16  ;;  %637 = vperm.xlu0 %915, %v546_v10   ;;  %p1021_p5 = pnand %p1020_p4, %p1014_p1 }
  0x4b   :  { %882 = vmatprep.mubr.msk.bf16.mxu0 %vm1045_vm0, %v1044_v1  ;;  %867 = vmatpush3.bf16.msra.mxu0 %v933_v19 }
  0x4c   :  { %868 = vmatprep.subr.bf16.mxu0 %v1044_v1 }
  0x4d   :  { %652 = vperm.xlu1 %916, %v549_v61  }
  0x4e   :  { %647 = vperm.xlu0 %915, %v548_v11  }
  0x4f   :  { %869 = vmatpush3.bf16.msra.mxu0 %v934_v20 }
  0x50   :  { %870 = vmatprep.subr.bf16.mxu0 %v1044_v1 }
  0x52   :  { %657 = vperm.xlu0 %915, %v550_v12  }
  0x53   :  { %871 = vmatpush3.bf16.msra.mxu0 %v935_v21 }
  0x54   :  { %872 = vmatprep.subr.bf16.mxu0 %v1044_v1 }
  0x56   :  { %662 = vperm.xlu0 %915, %v551_v13  }
  0x57   :  { %873 = vmatpush3.bf16.msra.mxu0 %v936_v22 }
  0x58   :  { %874 = vmatprep.subr.bf16.mxu0 %v1044_v1 }
  0x5a   :  { %721 = vperm.xlu0 %915, %v552_v14  }
  0x5b   :  { %875 = vmatpush3.bf16.msra.mxu0 %v937_v23 }
  0x5c   :  { %876 = vmatprep.subr.bf16.mxu0 %v1044_v1 }
  0x5f   :  { %877 = vmatpush3.bf16.msra.mxu0 %v938_v24 }
  0x60   :  { %878 = vmatprep.subr.bf16.mxu0 %v1044_v1 }
  0x63   :  { %879 = vmatpush3.bf16.msra.mxu0 %v939_v33 }
  0x64   :  { %880 = vmatprep.subr.bf16.mxu0 %v1044_v1 }
  0x67   :  { %881 = vmatpush3.bf16.msra.mxu0 %v940_v34 }
  0xb0   :  { %v598_v23 = vpop.permute.xlu1 %597 }
  0xb1   :  { %v588_v33 = vpop.permute.xlu0 %587 }
  0xb4   :  { %v603_v24 = vpop.permute.xlu1 %602 }
 0x10a   :  { %v205_v26 = vpop.f32.mrf.mxu0 }
 0x10b   :  { %v206_v27 = vadd.f32 %v753_v25, %v205_v26  ;;  %v613_v25 = vpop.permute.xlu1 %612 }
 0x10c   :  { %v844_v28 = vpop.f32.mrf.mxu0 }
 0x10d   :  { %v211_v29 = vmax.f32 %v206_v27, 0.0 }
 0x10e   :  { %v208_v30 = vpop.f32.mrf.mxu0 }
 0x10f   :  { %v212_v31 = vpack.c.bf16 %v211_v29, %v211_v29  ;;  %v623_v26 = vpop.permute.xlu1 %622 }
 0x110   :  { %v845_v32 = vpop.f32.mrf.mxu0 }
 0x111   :  { %863 = vmatmul.mubr.bf16.vlgmr.msra.gmra.mxu1 %v212_v31 }
 0x112   :  { %902 = vmatprep.mubr.msk.bf16.mxu1 %vm1045_vm0, %v1044_v1  ;;  %887 = vmatpush3.bf16.msra.mxu1 %v941_v35 }
 0x113   :  { %888 = vmatprep.subr.bf16.mxu1 %v1044_v1  ;;  %v633_v27 = vpop.permute.xlu1 %632 }
 0x116   :  { %889 = vmatpush3.bf16.msra.mxu1 %v942_v36  ;;  %v593_v36 = vpop.permute.xlu0 %592 }
 0x117   :  { %890 = vmatprep.subr.bf16.mxu1 %v1044_v1  ;;  %v643_v28 = vpop.permute.xlu1 %642 }
 0x11a   :  { %891 = vmatpush3.bf16.msra.mxu1 %v943_v37 }
 0x11b   :  { %892 = vmatprep.subr.bf16.mxu1 %v1044_v1  ;;  %v653_v29 = vpop.permute.xlu1 %652 }
 0x11e   :  { %893 = vmatpush3.bf16.msra.mxu1 %v944_v38  ;;  %v608_v38 = vpop.permute.xlu0 %607 }
 0x11f   :  { %894 = vmatprep.subr.bf16.mxu1 %v1044_v1 }
 0x122   :  { %895 = vmatpush3.bf16.msra.mxu1 %v945_v39 }
 0x123   :  { %896 = vmatprep.subr.bf16.mxu1 %v1044_v1 }
 0x126   :  { %897 = vmatpush3.bf16.msra.mxu1 %v946_v40 }
 0x127   :  { %898 = vmatprep.subr.bf16.mxu1 %v1044_v1 }
 0x12a   :  { %899 = vmatpush3.bf16.msra.mxu1 %v947_v51 }
 0x12b   :  { %900 = vmatprep.subr.bf16.mxu1 %v1044_v1 }
 0x12e   :  { %901 = vmatpush3.bf16.msra.mxu1 %v948_v52 }
 0x1d1   :  { %v301_v43 = vpop.f32.mrf.mxu1 }
 0x1d2   :  { %v302_v44 = vadd.f32 %v762_v41, %v301_v43 }
 0x1d3   :  { %v864_v45 = vpop.f32.mrf.mxu1 }
 0x1d4   :  { %v307_v46 = vadd.f32 %v302_v44, %v82_v42  ;;  %v618_v42 = vpop.permute.xlu0 %617 }
 0x1d5   :  { %v304_v47 = vpop.f32.mrf.mxu1 }
 0x1d6   :  { %v308_v48 = vmax.f32 %v307_v46, 0.0 }
 0x1d7   :  { %v865_v49 = vpop.f32.mrf.mxu1 }
 0x1d8   :  { %v343_v50 = vpack.c.bf16 %v308_v48, %v308_v48  ;;  %v628_v52 = vpop.permute.xlu0 %627 }
 0x1da   :  { %883 = vmatmul.mubr.bf16.vlgmr.msra.gmra.mxu0 %v343_v50 }
 0x29a   :  { %v432_v63 = vpop.f32.mrf.mxu0 }
 0x29b   :  { %v433_v0 = vadd.f32 %v771_v62, %v432_v63  ;;  %v638_v63 = vpop.permute.xlu0 %637 }
 0x29c   :  { %v884_v1 = vpop.f32.mrf.mxu0 }
 0x29d   :  { %v438_v2 = vmax.f32 %v433_v0, 0.0 }
 0x29e   :  { %v435_v3 = vpop.f32.mrf.mxu0 }
 0x29f   :  { %v439_v4 = vpack.c.bf16 %v438_v2, %v438_v2  ;;  %v648_v10 = vpop.permute.xlu0 %647 }
 0x2a0   :  { %v885_v5 = vpop.f32.mrf.mxu0 }
 0x2a1   :  { %903 = vmatmul.mubr.bf16.vlgmr.msra.gmra.mxu1 %v439_v4 }
 0x361   :  { %v528_v16 = vpop.f32.mrf.mxu1 }
 0x362   :  { %v529_v17 = vadd.f32 %v780_v15, %v528_v16 }
 0x363   :  { %v904_v18 = vpop.f32.mrf.mxu1 }
 0x364   :  { %v534_v19 = vadd.f32 %v529_v17, %v308_v48 }
 0x365   :  { %v531_v20 = vpop.f32.mrf.mxu1 }
 0x366   :  { %v535_v21 = vmax.f32 %v534_v19, 0.0 }
 0x367   :  { %v905_v22 = vpop.f32.mrf.mxu1 }
 0x368   :  { %553 = vxpose.xlu1.b32.start.end [1/1] (short) %v535_v21, 128  ;;  %v658_v22 = vpop.permute.xlu0 %657 }
 0x3e4   :  { %v569_v30 = vpop.trf.xlu1 }
 0x3e5   :  { %v665_v43 = vmul.f32 %v588_v33, %v569_v30 }
 0x3e7   :  { %v682_v48 = vsel %vm681_vm1, %v665_v43, 0.0 }
 0x3e8   :  { %v570_v31 = vpop.trf.xlu1 }
 0x3e9   :  { %v666_v41 = vmul.f32 %v593_v36, %v570_v31 }
 0x3eb   :  { %v683_v46 = vsel %vm681_vm1, %v666_v41, 0.0 }
 0x3ec   :  { %v571_v32 = vpop.trf.xlu1  ;;  %v684_v51 = vadd.f32 %v683_v46, %v682_v48 }
 0x3ed   :  { %v667_v44 = vmul.f32 %v598_v23, %v571_v32  ;;  %v663_v32 = vpop.permute.xlu0 %662 }
 0x3ef   :  { %v685_v49 = vsel %vm681_vm1, %v667_v44, 0.0 }
 0x3f0   :  { %v572_v34 = vpop.trf.xlu1  ;;  %v686_v56 = vadd.f32 %v685_v49, %v684_v51 }
 0x3f1   :  { %v668_v47 = vmul.f32 %v603_v24, %v572_v34 }
 0x3f3   :  { %v687_v54 = vsel %vm681_vm1, %v668_v47, 0.0 }
 0x3f4   :  { %v573_v35 = vpop.trf.xlu1  ;;  %v688_v59 = vadd.f32 %v687_v54, %v686_v56 }
 0x3f5   :  { %v669_v50 = vmul.f32 %v608_v38, %v573_v35 }
 0x3f7   :  { %v689_v57 = vsel %vm681_vm1, %v669_v50, 0.0 }
 0x3f8   :  { %v574_v37 = vpop.trf.xlu1  ;;  %v690_v0 = vadd.f32 %v689_v57, %v688_v59 }
 0x3f9   :  { %v670_v55 = vmul.f32 %v613_v25, %v574_v37 }
 0x3fb   :  { %v691_v61 = vsel %vm681_vm1, %v670_v55, 0.0 }
 0x3fc   :  { %v575_v39 = vpop.trf.xlu1  ;;  %v692_v3 = vadd.f32 %v691_v61, %v690_v0 }
 0x3fd   :  { %v671_v58 = vmul.f32 %v618_v42, %v575_v39 }
 0x3ff   :  { %v693_v1 = vsel %vm681_vm1, %v671_v58, 0.0 }
 0x400   :  { %v576_v40 = vpop.trf.xlu1  ;;  %v694_v7 = vadd.f32 %v693_v1, %v692_v3 }
 0x401   :  { %v672_v62 = vmul.f32 %v623_v26, %v576_v40 }
 0x403   :  { %v695_v5 = vsel %vm681_vm1, %v672_v62, 0.0 }
 0x404   :  { %v577_v45 = vpop.trf.xlu1  ;;  %v696_v11 = vadd.f32 %v695_v5, %v694_v7 }
 0x405   :  { %v673_v2 = vmul.f32 %v628_v52, %v577_v45  ;;  %v722_v45 = vpop.permute.xlu0 %721 }
 0x407   :  { %v697_v8 = vsel %vm681_vm1, %v673_v2, 0.0 }
 0x408   :  { %v578_v53 = vpop.trf.xlu1  ;;  %v698_v15 = vadd.f32 %v697_v8, %v696_v11 }
 0x409   :  { %v674_v6 = vmul.f32 %v633_v27, %v578_v53 }
 0x40b   :  { %v699_v13 = vsel %vm681_vm1, %v674_v6, 0.0 }
 0x40c   :  { %v579_v60 = vpop.trf.xlu1  ;;  %v700_v18 = vadd.f32 %v699_v13, %v698_v15 }
 0x40d   :  { %v675_v9 = vmul.f32 %v638_v63, %v579_v60 }
 0x40f   :  { %v701_v16 = vsel %vm681_vm1, %v675_v9, 0.0 }
 0x410   :  { %v580_v4 = vpop.trf.xlu1  ;;  %v702_v23 = vadd.f32 %v701_v16, %v700_v18 }
 0x411   :  { %v676_v14 = vmul.f32 %v643_v28, %v580_v4 }
 0x413   :  { %v703_v20 = vsel %vm681_vm1, %v676_v14, 0.0 }
 0x414   :  { %v581_v12 = vpop.trf.xlu1  ;;  %v704_v25 = vadd.f32 %v703_v20, %v702_v23 }
 0x415   :  { %v677_v17 = vmul.f32 %v648_v10, %v581_v12 }
 0x417   :  { %v705_v24 = vsel %vm681_vm1, %v677_v17, 0.0 }
 0x418   :  { %v582_v19 = vpop.trf.xlu1  ;;  %v706_v31 = vadd.f32 %v705_v24, %v704_v25 }
 0x419   :  { %v678_v21 = vmul.f32 %v653_v29, %v582_v19  ;;  %v724_v29 = vlaneseq }
 0x41b   :  { %v707_v27 = vsel %vm681_vm1, %v678_v21, 0.0  ;;  %v725_v40 = vshrl.u32 %v724_v29, 7 }
 0x41c   :  { %v583_v26 = vpop.trf.xlu1  ;;  %v708_v33 = vadd.f32 %v707_v27, %v706_v31 }
 0x41d   :  { %v679_v30 = vmul.f32 %v658_v22, %v583_v26  ;;  %v726_v43 = vsub.s32 0, %v725_v40 }
 0x41f   :  { %v709_v28 = vsel %vm681_vm1, %v679_v30, 0.0  ;;  %v727_v47 = vrot.slane %v722_v45, %v726_v43 }
 0x420   :  { %v584_v34 = vpop.trf.xlu1  ;;  %v710_v36 = vadd.f32 %v709_v28, %v708_v33 }
 0x421   :  { %v680_v35 = vmul.f32 %v663_v32, %v584_v34 }
 0x423   :  { %v711_v37 = vsel %vm681_vm1, %v680_v35, 0.0 }
 0x424   :  { %v712_v38 = vadd.f32 %v711_v37, %v710_v36 }
 0x426   :  { %v713_v39 = vrot.slane %v712_v38, 4 }
 0x428   :  { %v714_v41 = vadd.f32 %v713_v39, %v712_v38 }
 0x42a   :  { %v715_v42 = vrot.slane %v714_v41, 2 }
 0x42c   :  { %v716_v44 = vadd.f32 %v715_v42, %v714_v41 }
 0x42e   :  { %v717_v46 = vrot.slane %v716_v44, 1 }
 0x430   :  { %v718_v48 = vadd.f32 %v717_v46, %v716_v44 }
 0x432   :  { %v728_v49 = vadd.f32 %v727_v47, %v718_v48 }
 0x434   :  { %v789_v50 = vmul.f32 -1.442695, %v728_v49 }
 0x436   :  { %949 = vpow2.f32 %v789_v50 }
 0x443   :  { %v950_v51 = vpop.eup %949 }
 0x444   :  { %v732_v52 = vadd.f32 1.0, %v950_v51 }
 0x446   :  { %951 = vrcp.f32 %v732_v52 }
 0x453   :  { %v952_v53 = vpop.eup %951 }
 0x454   :  { %736 = vst.msk [vmem:[#allocation9] sm:$0x1] %vm735_vm2, %v952_v53 }
 0x455   :  { %1024 = shalt.err (!%p1021_p5)
}
 0x456   :  { %746 = dma.vmem_to_hbm [thread:$0]  %s744_s9, 16, %s1302_s11, [#allocation5]  }
 0x457   :  { %1037 = dma.done.wait [#allocation5], 16  }
 0x458   :  { %1038 = vsyncadd [#allocation5], 4294967280 }
 0x459   :  { %750 = vsyncpa [#allocation4], 1 }
 0x45a   :  { %751 = vsyncpa [#allocation7], 1 }
 0x45b   :  { %752 = vsyncpa [#allocation5], 1 }

// kernel: tpu_custom_call.1
= control target key start
LH: loop header
LB: loop body
LE: loop exit
PB: predicated region body
PF: predicated region fallthrough
CT: control target
= control target key end

     0   :  { %s1291_s0 = inlined_call_operand.hbm [shape: bf16[8,128], index: 0, kind: input, shape index: {}]   ;;  %s1292_s1 = inlined_call_operand.vmem [shape: bf16[128,128], index: 1, kind: input, shape index: {}]   ;;  %s1293_s2 = inlined_call_operand.vmem [shape: f32[1,128], index: 2, kind: input, shape index: {}]   ;;  %s1294_s3 = inlined_call_operand.vmem [shape: bf16[128,128], index: 3, kind: input, shape index: {}]   ;;  %s1295_s4 = inlined_call_operand.vmem [shape: f32[1,128], index: 4, kind: input, shape index: {}]   ;;  %s1296_s5 = inlined_call_operand.hbm [shape: bf16[128,128], index: 5, kind: input, shape index: {}]   ;;  %s1297_s6 = inlined_call_operand.vmem [shape: f32[1,128], index: 6, kind: input, shape index: {}]   ;;  %s1298_s7 = inlined_call_operand.hbm [shape: bf16[128,128], index: 7, kind: input, shape index: {}]   ;;  %s1299_s8 = inlined_call_operand.vmem [shape: f32[1,128], index: 8, kind: input, shape index: {}]   ;;  %s1300_s9 = inlined_call_operand.vmem [shape: f32[128,1], index: 9, kind: input, shape index: {}]   ;;  %s1301_s10 = inlined_call_operand.<no memory space> [shape: f32[1,1], index: 10, kind: input, shape index: {}]   ;;  %s1302_s11 = inlined_call_operand.hbm [shape: f32[1,1,8], index: 11, kind: output, shape index: {}]  }
   0x1   :  { %v16_v0 = vstv %s1301_s10 }
   0x2   :  { %17 = vst [vmem:[#allocation2] sm:$0x1] %v16_v0 }
   0x3   :  { %18 = vsyncpa [#allocation4], 0 }
   0x4   :  { %19 = vsyncpa [#allocation7], 0 }
   0x5   :  { %20 = vsyncpa [#allocation5], 0  ;;  %s1039_s19 = smov [#allocation6]  }
   0x6   :  { %s44_s20 = sshll.u32 %s1039_s19, 4  ;;  %s45_s20 = int_to_ptr.vmem [resolvable:$true] %s44_s20 }
   0x7   :  { %s961_s21 = scalar_lea.vmem %s45_s20, 1024  ;;  %p966_p1 = scmp.lt.s32.totalorder %s45_s20, %s45_s20 }
   0x8   :  { %p962_p0 = scmp.ne.s32.totalorder %s45_s20, %s961_s21  ;;  %p967_p2 = scmp.lt.s32.totalorder %s961_s21, %s961_s21 }
   0xa   :  { %p968_p3 = por %p967_p2, %p966_p1 }
   0xc   :  { %p969_p4 = pnand %p968_p3, %p962_p0 }
   0xe   :  { %972 = shalt.err (!%p969_p4)
}
   0xf   :  { %s1040_s22 = smov 64   ;;  %s1041_s23 = smov 4  }
  0x10   :  { %50 = dma.hbm_to_vmem [thread:$0]  %s1296_s5, 1024, %s45_s20, [#allocation7], %s1040_s22, %s1040_s22, %s1041_s23  }
  0x11   :  { %s1042_s10 = smov [#allocation3]   ;;  %s1043_s27 = smov [#allocation8]  }
  0x12   :  { %s27_s26 = sshll.u32 %s1042_s10, 4  ;;  %s58_s28 = sshll.u32 %s1043_s27, 4  ;;  %s28_s26 = int_to_ptr.vmem [resolvable:$true] %s27_s26  ;;  %s59_s28 = int_to_ptr.vmem [resolvable:$true] %s58_s28 }
  0x13   :  { %s981_s29 = scalar_lea.vmem %s28_s26, 64  ;;  %p986_p6 = scmp.lt.s32.totalorder %s28_s26, %s28_s26 }
  0x14   :  { %p982_p5 = scmp.ne.s32.totalorder %s28_s26, %s981_s29  ;;  %p987_p7 = scmp.lt.s32.totalorder %s981_s29, %s981_s29 }
  0x16   :  { %p988_p8 = por %p987_p7, %p986_p6 }
  0x18   :  { %p989_p9 = pnand %p988_p8, %p982_p5 }
  0x1a   :  { %992 = shalt.err (!%p989_p9)
}
  0x1b   :  { %30 = dma.hbm_to_vmem [thread:$0]  %s1291_s0, 64, %s28_s26, [#allocation4]  }
  0x1c   :  { %s1001_s13 = scalar_lea.vmem %s59_s28, 1024  ;;  %p1006_p11 = scmp.lt.s32.totalorder %s59_s28, %s59_s28 }
  0x1d   :  { %p1002_p10 = scmp.ne.s32.totalorder %s59_s28, %s1001_s13  ;;  %p1007_p12 = scmp.lt.s32.totalorder %s1001_s13, %s1001_s13 }
  0x1f   :  { %p1008_p13 = por %p1007_p12, %p1006_p11 }
  0x21   :  { %p1009_p0 = pnand %p1008_p13, %p1002_p10 }
  0x23   :  { %1012 = shalt.err (!%p1009_p0)
}
  0x24   :  { %64 = dma.hbm_to_vmem [thread:$0]  %s1298_s7, 1024, %s59_s28, [#allocation7], %s1040_s22, %s1040_s22, %s1041_s23  }
  0x25   :  { %1033 = dma.done.wait [#allocation4], 64  }
  0x26   :  { %1034 = vsyncadd [#allocation4], 4294967232 }
  0x27   :  { %1035 = dma.done.wait [#allocation7], 2048  }
  0x28   :  { %1036 = vsyncadd [#allocation7], 4294965248  ;;  %v1044_v1 = vmov 0.0   ;;  %vm1045_vm0 = vmmov 0   ;;  %v917_v2 = vld [vmem:[%s1292_s1 + $0x38] sm:$0xff]   ;;  %v918_v3 = vld [vmem:[%s1292_s1 + $0x30] sm:$0xff]  }
  0x29   :  { %826 = vmatprep.subr.bf16.mxu0 %v1044_v1  ;;  %842 = vmatprep.mubr.msk.bf16.mxu0 %vm1045_vm0, %v1044_v1  ;;  %v919_v4 = vld [vmem:[%s1292_s1 + $0x28] sm:$0xff]   ;;  %v925_v5 = vld [vmem:[%s1294_s3 + $0x38] sm:$0xff]   ;;  %v920_v6 = vld [vmem:[%s1292_s1 + $0x20] sm:$0xff]   ;;  %v1046_v54 = vmov 0   ;;  %vm681_vm1 = vcmask 64512   ;;  %vm735_vm2 = vcmask 57344  }
  0x2a   :  { %846 = vmatprep.subr.bf16.mxu1 %v1044_v1  ;;  %862 = vmatprep.mubr.msk.bf16.mxu1 %vm1045_vm0, %v1044_v1  ;;  %v926_v7 = vld [vmem:[%s1294_s3 + $0x30] sm:$0xff]   ;;  %v921_v8 = vld [vmem:[%s1292_s1 + $0x18] sm:$0xff]   ;;  %v927_v9 = vld [vmem:[%s1294_s3 + $0x28] sm:$0xff]  }
  0x2b   :  { %827 = vmatpush3.bf16.msra.mxu0 %v917_v2  ;;  %847 = vmatpush3.bf16.msra.mxu1 %v925_v5  ;;  %v922_v10 = vld [vmem:[%s1292_s1 + $0x10] sm:$0xff]   ;;  %v928_v11 = vld [vmem:[%s1294_s3 + $0x20] sm:$0xff]   ;;  %v923_v12 = vld [vmem:[%s1292_s1 + $0x8] sm:$0xff]  }
  0x2c   :  { %828 = vmatprep.subr.bf16.mxu0 %v1044_v1  ;;  %848 = vmatprep.subr.bf16.mxu1 %v1044_v1  ;;  %v929_v13 = vld [vmem:[%s1294_s3 + $0x18] sm:$0xff]   ;;  %v924_v14 = vld [vmem:[%s1292_s1] sm:$0xff]   ;;  %v930_v15 = vld [vmem:[%s1294_s3 + $0x10] sm:$0xff]  }
  0x2d   :  { %v1180_v16 = vld [vmem:[#allocation3] sm:$0xf]  ;;  %v931_v17 = vld [vmem:[%s1294_s3 + $0x8] sm:$0xff]   ;;  %v934_v20 = vld [vmem:[#allocation6 + $0x30] sm:$0xff]   ;;  %916 = vset.pattern.permute.xlu1 %v1046_v54  ;;  %915 = vset.pattern.permute.xlu0 %v1046_v54 }
  0x2e   :  { %v932_v18 = vld [vmem:[%s1294_s3] sm:$0xff]   ;;  %v935_v21 = vld [vmem:[#allocation6 + $0x28] sm:$0xff]   ;;  %v938_v24 = vld [vmem:[#allocation6 + $0x10] sm:$0xff]   ;;  %v82_v42 = vunpack.c.l.bf16 %v1180_v16 }
  0x2f   :  { %829 = vmatpush3.bf16.msra.mxu0 %v918_v3  ;;  %849 = vmatpush3.bf16.msra.mxu1 %v926_v7  ;;  %v933_v19 = vld [vmem:[#allocation6 + $0x38] sm:$0xff]   ;;  %v936_v22 = vld [vmem:[#allocation6 + $0x20] sm:$0xff]   ;;  %v939_v33 = vld [vmem:[#allocation6 + $0x8] sm:$0xff]  }
  0x30   :  { %830 = vmatprep.subr.bf16.mxu0 %v1044_v1  ;;  %850 = vmatprep.subr.bf16.mxu1 %v1044_v1  ;;  %v937_v23 = vld [vmem:[#allocation6 + $0x18] sm:$0xff]   ;;  %v940_v34 = vld [vmem:[#allocation6] sm:$0xff]   ;;  %v942_v36 = vld [vmem:[#allocation8 + $0x30] sm:$0xff]  }
  0x31   :  { %v753_v25 = vld [vmem:[%s1293_s2] ss:$0 sm:$0xff]  ;;  %v943_v37 = vld [vmem:[#allocation8 + $0x28] sm:$0xff]   ;;  %v944_v38 = vld [vmem:[#allocation8 + $0x20] sm:$0xff]  }
  0x32   :  { %v941_v35 = vld [vmem:[#allocation8 + $0x38] sm:$0xff]   ;;  %v946_v40 = vld [vmem:[#allocation8 + $0x10] sm:$0xff]   ;;  %v947_v51 = vld [vmem:[#allocation8 + $0x8] sm:$0xff]  }
  0x33   :  { %831 = vmatpush3.bf16.msra.mxu0 %v919_v4  ;;  %851 = vmatpush3.bf16.msra.mxu1 %v927_v9  ;;  %v945_v39 = vld [vmem:[#allocation8 + $0x18] sm:$0xff]   ;;  %v948_v52 = vld [vmem:[#allocation8] sm:$0xff]   ;;  %v538_v53 = vld [vmem:[%s1300_s9 + $0x10] sm:$0xff] }
  0x34   :  { %832 = vmatprep.subr.bf16.mxu0 %v1044_v1  ;;  %852 = vmatprep.subr.bf16.mxu1 %v1044_v1  ;;  %v762_v41 = vld [vmem:[%s1295_s4] ss:$0 sm:$0xff]  ;;  %v539_v56 = vld [vmem:[%s1300_s9 + $0x18] sm:$0xff]  ;;  %v541_v57 = vld [vmem:[%s1300_s9 + $0x28] sm:$0xff] }
  0x35   :  { %597 = vperm.xlu1 %916, %v538_v53   ;;  %v536_v55 = vld [vmem:[%s1300_s9] sm:$0xff]  ;;  %v543_v58 = vld [vmem:[%s1300_s9 + $0x38] sm:$0xff]  ;;  %v545_v59 = vld [vmem:[%s1300_s9 + $0x48] sm:$0xff] }
  0x36   :  { %587 = vperm.xlu0 %915, %v536_v55   ;;  %v547_v60 = vld [vmem:[%s1300_s9 + $0x58] sm:$0xff]  ;;  %v549_v61 = vld [vmem:[%s1300_s9 + $0x68] sm:$0xff]  ;;  %v771_v62 = vld [vmem:[%s1297_s6] ss:$0 sm:$0xff] }
  0x37   :  { %833 = vmatpush3.bf16.msra.mxu0 %v920_v6  ;;  %853 = vmatpush3.bf16.msra.mxu1 %v928_v11  ;;  %v537_v6 = vld [vmem:[%s1300_s9 + $0x8] sm:$0xff]  ;;  %v540_v7 = vld [vmem:[%s1300_s9 + $0x20] sm:$0xff] }
  0x38   :  { %834 = vmatprep.subr.bf16.mxu0 %v1044_v1  ;;  %854 = vmatprep.subr.bf16.mxu1 %v1044_v1  ;;  %v544_v9 = vld [vmem:[%s1300_s9 + $0x40] sm:$0xff] }
  0x39   :  { %602 = vperm.xlu1 %916, %v539_v56   ;;  %v548_v11 = vld [vmem:[%s1300_s9 + $0x60] sm:$0xff] }
  0x3a   :  { %592 = vperm.xlu0 %915, %v537_v6  }
  0x3b   :  { %835 = vmatpush3.bf16.msra.mxu0 %v921_v8  ;;  %855 = vmatpush3.bf16.msra.mxu1 %v929_v13  ;;  %v542_v8 = vld [vmem:[%s1300_s9 + $0x30] sm:$0xff]  ;;  %v551_v13 = vld [vmem:[%s1300_s9 + $0x78] sm:$0xff] }
  0x3c   :  { %836 = vmatprep.subr.bf16.mxu0 %v1044_v1  ;;  %856 = vmatprep.subr.bf16.mxu1 %v1044_v1 }
  0x3d   :  { %612 = vperm.xlu1 %916, %v541_v57  }
  0x3e   :  { %607 = vperm.xlu0 %915, %v540_v7  }
  0x3f   :  { %837 = vmatpush3.bf16.msra.mxu0 %v922_v10  ;;  %857 = vmatpush3.bf16.msra.mxu1 %v930_v15  ;;  %v546_v10 = vld [vmem:[%s1300_s9 + $0x50] sm:$0xff]  ;;  %v780_v15 = vld [vmem:[%s1299_s8] ss:$0 sm:$0xff]  ;;  %s1047_s8 = smov [#allocation9]  }
  0x40   :  { %838 = vmatprep.subr.bf16.mxu0 %v1044_v1  ;;  %858 = vmatprep.subr.bf16.mxu1 %v1044_v1 }
  0x41   :  { %622 = vperm.xlu1 %916, %v543_v58  }
  0x42   :  { %617 = vperm.xlu0 %915, %v542_v8  }
  0x43   :  { %839 = vmatpush3.bf16.msra.mxu0 %v923_v12  ;;  %859 = vmatpush3.bf16.msra.mxu1 %v931_v17  ;;  %v550_v12 = vld [vmem:[%s1300_s9 + $0x70] sm:$0xff]  ;;  %s743_s9 = sshll.u32 %s1047_s8, 4  ;;  %s744_s9 = int_to_ptr.vmem [resolvable:$true] %s743_s9 }
  0x44   :  { %840 = vmatprep.subr.bf16.mxu0 %v1044_v1  ;;  %860 = vmatprep.subr.bf16.mxu1 %v1044_v1  ;;  %s1013_s29 = scalar_lea.vmem %s744_s9, 16  ;;  %s1017_s30 = scalar_lea.vmem %s744_s9, 32 }
  0x45   :  { %632 = vperm.xlu1 %916, %v545_v59   ;;  %p1014_p1 = scmp.ne.s32.totalorder %s744_s9, %s1013_s29  ;;  %p1018_p2 = scmp.lt.s32.totalorder %s744_s9, %s744_s9 }
  0x46   :  { %627 = vperm.xlu0 %915, %v544_v9   ;;  %p1019_p3 = scmp.lt.s32.totalorder %s1017_s30, %s1013_s29 }
  0x47   :  { %841 = vmatpush3.bf16.msra.mxu0 %v924_v14  ;;  %861 = vmatpush3.bf16.msra.mxu1 %v932_v18  ;;  %v552_v14 = vld [vmem:[#allocation2] sm:$0x1] }
  0x48   :  { %866 = vmatprep.subr.bf16.mxu0 %v1044_v1  ;;  %886 = vmatprep.subr.bf16.mxu1 %v1044_v1  ;;  %p1020_p4 = por %p1019_p3, %p1018_p2 }
  0x49   :  { %642 = vperm.xlu1 %916, %v547_v60  }
  0x4a   :  { %843 = vmatmul.mubr.bf16.vlgmr.msra.gmra.mxu0 %v1180_v16  ;;  %637 = vperm.xlu0 %915, %v546_v10   ;;  %p1021_p5 = pnand %p1020_p4, %p1014_p1 }
  0x4b   :  { %882 = vmatprep.mubr.msk.bf16.mxu0 %vm1045_vm0, %v1044_v1  ;;  %867 = vmatpush3.bf16.msra.mxu0 %v933_v19 }
  0x4c   :  { %868 = vmatprep.subr.bf16.mxu0 %v1044_v1 }
  0x4d   :  { %652 = vperm.xlu1 %916, %v549_v61  }
  0x4e   :  { %647 = vperm.xlu0 %915, %v548_v11  }
  0x4f   :  { %869 = vmatpush3.bf16.msra.mxu0 %v934_v20 }
  0x50   :  { %870 = vmatprep.subr.bf16.mxu0 %v1044_v1 }
  0x52   :  { %657 = vperm.xlu0 %915, %v550_v12  }
  0x53   :  { %871 = vmatpush3.bf16.msra.mxu0 %v935_v21 }
  0x54   :  { %872 = vmatprep.subr.bf16.mxu0 %v1044_v1 }
  0x56   :  { %662 = vperm.xlu0 %915, %v551_v13  }
  0x57   :  { %873 = vmatpush3.bf16.msra.mxu0 %v936_v22 }
  0x58   :  { %874 = vmatprep.subr.bf16.mxu0 %v1044_v1 }
  0x5a   :  { %721 = vperm.xlu0 %915, %v552_v14  }
  0x5b   :  { %875 = vmatpush3.bf16.msra.mxu0 %v937_v23 }
  0x5c   :  { %876 = vmatprep.subr.bf16.mxu0 %v1044_v1 }
  0x5f   :  { %877 = vmatpush3.bf16.msra.mxu0 %v938_v24 }
  0x60   :  { %878 = vmatprep.subr.bf16.mxu0 %v1044_v1 }
  0x63   :  { %879 = vmatpush3.bf16.msra.mxu0 %v939_v33 }
  0x64   :  { %880 = vmatprep.subr.bf16.mxu0 %v1044_v1 }
  0x67   :  { %881 = vmatpush3.bf16.msra.mxu0 %v940_v34 }
  0xb0   :  { %v598_v23 = vpop.permute.xlu1 %597 }
  0xb1   :  { %v588_v33 = vpop.permute.xlu0 %587 }
  0xb4   :  { %v603_v24 = vpop.permute.xlu1 %602 }
 0x10a   :  { %v205_v26 = vpop.f32.mrf.mxu0 }
 0x10b   :  { %v206_v27 = vadd.f32 %v753_v25, %v205_v26  ;;  %v613_v25 = vpop.permute.xlu1 %612 }
 0x10c   :  { %v844_v28 = vpop.f32.mrf.mxu0 }
 0x10d   :  { %v211_v29 = vmax.f32 %v206_v27, 0.0 }
 0x10e   :  { %v208_v30 = vpop.f32.mrf.mxu0 }
 0x10f   :  { %v212_v31 = vpack.c.bf16 %v211_v29, %v211_v29  ;;  %v623_v26 = vpop.permute.xlu1 %622 }
 0x110   :  { %v845_v32 = vpop.f32.mrf.mxu0 }
 0x111   :  { %863 = vmatmul.mubr.bf16.vlgmr.msra.gmra.mxu1 %v212_v31 }
 0x112   :  { %902 = vmatprep.mubr.msk.bf16.mxu1 %vm1045_vm0, %v1044_v1  ;;  %887 = vmatpush3.bf16.msra.mxu1 %v941_v35 }
 0x113   :  { %888 = vmatprep.subr.bf16.mxu1 %v1044_v1  ;;  %v633_v27 = vpop.permute.xlu1 %632 }
 0x116   :  { %889 = vmatpush3.bf16.msra.mxu1 %v942_v36  ;;  %v593_v36 = vpop.permute.xlu0 %592 }
 0x117   :  { %890 = vmatprep.subr.bf16.mxu1 %v1044_v1  ;;  %v643_v28 = vpop.permute.xlu1 %642 }
 0x11a   :  { %891 = vmatpush3.bf16.msra.mxu1 %v943_v37 }
 0x11b   :  { %892 = vmatprep.subr.bf16.mxu1 %v1044_v1  ;;  %v653_v29 = vpop.permute.xlu1 %652 }
 0x11e   :  { %893 = vmatpush3.bf16.msra.mxu1 %v944_v38  ;;  %v608_v38 = vpop.permute.xlu0 %607 }
 0x11f   :  { %894 = vmatprep.subr.bf16.mxu1 %v1044_v1 }
 0x122   :  { %895 = vmatpush3.bf16.msra.mxu1 %v945_v39 }
 0x123   :  { %896 = vmatprep.subr.bf16.mxu1 %v1044_v1 }
 0x126   :  { %897 = vmatpush3.bf16.msra.mxu1 %v946_v40 }
 0x127   :  { %898 = vmatprep.subr.bf16.mxu1 %v1044_v1 }
 0x12a   :  { %899 = vmatpush3.bf16.msra.mxu1 %v947_v51 }
 0x12b   :  { %900 = vmatprep.subr.bf16.mxu1 %v1044_v1 }
 0x12e   :  { %901 = vmatpush3.bf16.msra.mxu1 %v948_v52 }
 0x1d1   :  { %v301_v43 = vpop.f32.mrf.mxu1 }
 0x1d2   :  { %v302_v44 = vadd.f32 %v762_v41, %v301_v43 }
 0x1d3   :  { %v864_v45 = vpop.f32.mrf.mxu1 }
 0x1d4   :  { %v307_v46 = vadd.f32 %v302_v44, %v82_v42  ;;  %v618_v42 = vpop.permute.xlu0 %617 }
 0x1d5   :  { %v304_v47 = vpop.f32.mrf.mxu1 }
 0x1d6   :  { %v308_v48 = vmax.f32 %v307_v46, 0.0 }
 0x1d7   :  { %v865_v49 = vpop.f32.mrf.mxu1 }
 0x1d8   :  { %v343_v50 = vpack.c.bf16 %v308_v48, %v308_v48  ;;  %v628_v52 = vpop.permute.xlu0 %627 }
 0x1da   :  { %883 = vmatmul.mubr.bf16.vlgmr.msra.gmra.mxu0 %v343_v50 }
 0x29a   :  { %v432_v63 = vpop.f32.mrf.mxu0 }
 0x29b   :  { %v433_v0 = vadd.f32 %v771_v62, %v432_v63  ;;  %v638_v63 = vpop.permute.xlu0 %637 }
 0x29c   :  { %v884_v1 = vpop.f32.mrf.mxu0 }
 0x29d   :  { %v438_v2 = vmax.f32 %v433_v0, 0.0 }
 0x29e   :  { %v435_v3 = vpop.f32.mrf.mxu0 }
 0x29f   :  { %v439_v4 = vpack.c.bf16 %v438_v2, %v438_v2  ;;  %v648_v10 = vpop.permute.xlu0 %647 }
 0x2a0   :  { %v885_v5 = vpop.f32.mrf.mxu0 }
 0x2a1   :  { %903 = vmatmul.mubr.bf16.vlgmr.msra.gmra.mxu1 %v439_v4 }
 0x361   :  { %v528_v16 = vpop.f32.mrf.mxu1 }
 0x362   :  { %v529_v17 = vadd.f32 %v780_v15, %v528_v16 }
 0x363   :  { %v904_v18 = vpop.f32.mrf.mxu1 }
 0x364   :  { %v534_v19 = vadd.f32 %v529_v17, %v308_v48 }
 0x365   :  { %v531_v20 = vpop.f32.mrf.mxu1 }
 0x366   :  { %v535_v21 = vmax.f32 %v534_v19, 0.0 }
 0x367   :  { %v905_v22 = vpop.f32.mrf.mxu1 }
 0x368   :  { %553 = vxpose.xlu1.b32.start.end [1/1] (short) %v535_v21, 128  ;;  %v658_v22 = vpop.permute.xlu0 %657 }
 0x3e4   :  { %v569_v30 = vpop.trf.xlu1 }
 0x3e5   :  { %v665_v43 = vmul.f32 %v588_v33, %v569_v30 }
 0x3e7   :  { %v682_v48 = vsel %vm681_vm1, %v665_v43, 0.0 }
 0x3e8   :  { %v570_v31 = vpop.trf.xlu1 }
 0x3e9   :  { %v666_v41 = vmul.f32 %v593_v36, %v570_v31 }
 0x3eb   :  { %v683_v46 = vsel %vm681_vm1, %v666_v41, 0.0 }
 0x3ec   :  { %v571_v32 = vpop.trf.xlu1  ;;  %v684_v51 = vadd.f32 %v683_v46, %v682_v48 }
 0x3ed   :  { %v667_v44 = vmul.f32 %v598_v23, %v571_v32  ;;  %v663_v32 = vpop.permute.xlu0 %662 }
 0x3ef   :  { %v685_v49 = vsel %vm681_vm1, %v667_v44, 0.0 }
 0x3f0   :  { %v572_v34 = vpop.trf.xlu1  ;;  %v686_v56 = vadd.f32 %v685_v49, %v684_v51 }
 0x3f1   :  { %v668_v47 = vmul.f32 %v603_v24, %v572_v34 }
 0x3f3   :  { %v687_v54 = vsel %vm681_vm1, %v668_v47, 0.0 }
 0x3f4   :  { %v573_v35 = vpop.trf.xlu1  ;;  %v688_v59 = vadd.f32 %v687_v54, %v686_v56 }
 0x3f5   :  { %v669_v50 = vmul.f32 %v608_v38, %v573_v35 }
 0x3f7   :  { %v689_v57 = vsel %vm681_vm1, %v669_v50, 0.0 }
 0x3f8   :  { %v574_v37 = vpop.trf.xlu1  ;;  %v690_v0 = vadd.f32 %v689_v57, %v688_v59 }
 0x3f9   :  { %v670_v55 = vmul.f32 %v613_v25, %v574_v37 }
 0x3fb   :  { %v691_v61 = vsel %vm681_vm1, %v670_v55, 0.0 }
 0x3fc   :  { %v575_v39 = vpop.trf.xlu1  ;;  %v692_v3 = vadd.f32 %v691_v61, %v690_v0 }
 0x3fd   :  { %v671_v58 = vmul.f32 %v618_v42, %v575_v39 }
 0x3ff   :  { %v693_v1 = vsel %vm681_vm1, %v671_v58, 0.0 }
 0x400   :  { %v576_v40 = vpop.trf.xlu1  ;;  %v694_v7 = vadd.f32 %v693_v1, %v692_v3 }
 0x401   :  { %v672_v62 = vmul.f32 %v623_v26, %v576_v40 }
 0x403   :  { %v695_v5 = vsel %vm681_vm1, %v672_v62, 0.0 }
 0x404   :  { %v577_v45 = vpop.trf.xlu1  ;;  %v696_v11 = vadd.f32 %v695_v5, %v694_v7 }
 0x405   :  { %v673_v2 = vmul.f32 %v628_v52, %v577_v45  ;;  %v722_v45 = vpop.permute.xlu0 %721 }
 0x407   :  { %v697_v8 = vsel %vm681_vm1, %v673_v2, 0.0 }
 0x408   :  { %v578_v53 = vpop.trf.xlu1  ;;  %v698_v15 = vadd.f32 %v697_v8, %v696_v11 }
 0x409   :  { %v674_v6 = vmul.f32 %v633_v27, %v578_v53 }
 0x40b   :  { %v699_v13 = vsel %vm681_vm1, %v674_v6, 0.0 }
 0x40c   :  { %v579_v60 = vpop.trf.xlu1  ;;  %v700_v18 = vadd.f32 %v699_v13, %v698_v15 }
 0x40d   :  { %v675_v9 = vmul.f32 %v638_v63, %v579_v60 }
 0x40f   :  { %v701_v16 = vsel %vm681_vm1, %v675_v9, 0.0 }
 0x410   :  { %v580_v4 = vpop.trf.xlu1  ;;  %v702_v23 = vadd.f32 %v701_v16, %v700_v18 }
 0x411   :  { %v676_v14 = vmul.f32 %v643_v28, %v580_v4 }
 0x413   :  { %v703_v20 = vsel %vm681_vm1, %v676_v14, 0.0 }
 0x414   :  { %v581_v12 = vpop.trf.xlu1  ;;  %v704_v25 = vadd.f32 %v703_v20, %v702_v23 }
 0x415   :  { %v677_v17 = vmul.f32 %v648_v10, %v581_v12 }
 0x417   :  { %v705_v24 = vsel %vm681_vm1, %v677_v17, 0.0 }
 0x418   :  { %v582_v19 = vpop.trf.xlu1  ;;  %v706_v31 = vadd.f32 %v705_v24, %v704_v25 }
 0x419   :  { %v678_v21 = vmul.f32 %v653_v29, %v582_v19  ;;  %v724_v29 = vlaneseq }
 0x41b   :  { %v707_v27 = vsel %vm681_vm1, %v678_v21, 0.0  ;;  %v725_v40 = vshrl.u32 %v724_v29, 7 }
 0x41c   :  { %v583_v26 = vpop.trf.xlu1  ;;  %v708_v33 = vadd.f32 %v707_v27, %v706_v31 }
 0x41d   :  { %v679_v30 = vmul.f32 %v658_v22, %v583_v26  ;;  %v726_v43 = vsub.s32 0, %v725_v40 }
 0x41f   :  { %v709_v28 = vsel %vm681_vm1, %v679_v30, 0.0  ;;  %v727_v47 = vrot.slane %v722_v45, %v726_v43 }
 0x420   :  { %v584_v34 = vpop.trf.xlu1  ;;  %v710_v36 = vadd.f32 %v709_v28, %v708_v33 }
 0x421   :  { %v680_v35 = vmul.f32 %v663_v32, %v584_v34 }
 0x423   :  { %v711_v37 = vsel %vm681_vm1, %v680_v35, 0.0 }
 0x424   :  { %v712_v38 = vadd.f32 %v711_v37, %v710_v36 }
 0x426   :  { %v713_v39 = vrot.slane %v712_v38, 4 }
 0x428   :  { %v714_v41 = vadd.f32 %v713_v39, %v712_v38 }
 0x42a   :  { %v715_v42 = vrot.slane %v714_v41, 2 }
 0x42c   :  { %v716_v44 = vadd.f32 %v715_v42, %v714_v41 }
 0x42e   :  { %v717_v46 = vrot.slane %v716_v44, 1 }
 0x430   :  { %v718_v48 = vadd.f32 %v717_v46, %v716_v44 }
 0x432   :  { %v728_v49 = vadd.f32 %v727_v47, %v718_v48 }
 0x434   :  { %v789_v50 = vmul.f32 -1.442695, %v728_v49 }
 0x436   :  { %949 = vpow2.f32 %v789_v50 }
 0x443   :  { %v950_v51 = vpop.eup %949 }
 0x444   :  { %v732_v52 = vadd.f32 1.0, %v950_v51 }
 0x446   :  { %951 = vrcp.f32 %v732_v52 }
 0x453   :  { %v952_v53 = vpop.eup %951 }
 0x454   :  { %736 = vst.msk [vmem:[#allocation9] sm:$0x1] %vm735_vm2, %v952_v53 }
 0x455   :  { %1024 = shalt.err (!%p1021_p5)
}
 0x456   :  { %746 = dma.vmem_to_hbm [thread:$0]  %s744_s9, 16, %s1302_s11, [#allocation5]  }
 0x457   :  { %1037 = dma.done.wait [#allocation5], 16  }
 0x458   :  { %1038 = vsyncadd [#allocation5], 4294967280 }
 0x459   :  { %750 = vsyncpa [#allocation4], 1 }
 0x45a   :  { %751 = vsyncpa [#allocation7], 1 }
 0x45b   :  { %752 = vsyncpa [#allocation5], 1 }

</bundles_post_ra>
